<compile_context>
chip_gen: v6e
topology: v6e:2x2x1
jax: 0.10.0
libtpu: 0.0.40
codegen_flags: <defaults>
</compile_context>

<pallas_src>
import jax
import jax.numpy as jnp
import numpy as np
from jax import lax
from jax.experimental import pallas as pl
from jax.experimental.pallas import tpu as pltpu


def _encoder_lstm_kernel(ids_ref,      # SMEM (T,)     int32 token ids (scalar prefetch)
                         emb_hbm,      # HBM  (V, E)   f32 embedding table (pl.ANY)
                         wih_ref,      # VMEM (E, 4H)  bf16 fused input weights, gate order i|f|g|o
                         whh_ref,      # VMEM (H, 4H)  bf16 fused recurrent weights
                         b_ref,        # VMEM (1, 4H)  f32 fused bias (b_ih + b_hh)
                         out_ref,      # VMEM (T+1, H) f32: rows 0..T-1 = h_t, row T = final c
                         xs_sc,        # VMEM (T, E)   f32 scratch: gathered embeddings
                         xproj_sc,     # VMEM (T, 4H)  f32 scratch: hoisted X @ W_ih + b
                         gather_sem):  # DMA sems (T,)
    T = ids_ref.shape[0]
    H4 = whh_ref.shape[1]
    H = H4 // 4

    # --- Fused embedding gather: T row-DMAs HBM -> VMEM, all in flight at once.
    # (Eval-mode dropout is the identity, so the gathered rows are the inputs.)
    # TODO(synk): training-mode dropout (stochastic masking via pltpu.prng_*) omitted.
    copies = []
    for t in range(T):                                    # T is small & static
        cp = pltpu.make_async_copy(
            emb_hbm.at[pl.ds(ids_ref[t], 1), :],
            xs_sc.at[pl.ds(t, 1), :],
            gather_sem.at[t])
        cp.start()
        copies.append(cp)
    for cp in copies:
        cp.wait()

    # --- Hoisted, non-recurrent input projection: one lane-dense bf16 MXU matmul.
    xproj_sc[...] = (
        jnp.dot(xs_sc[...].astype(jnp.bfloat16), wih_ref[...],
                preferred_element_type=jnp.float32)
        + b_ref[...]
    )

    # Recurrent weight resident in vregs (bf16 -> half the vreg footprint).
    w_hh = whh_ref[...]                                   # (H, 4H) bf16

    # --- Single-tanh gate constants (loop-invariant, hoisted):
    #   sigmoid lanes (i|f|o): act = 0.5*tanh(0.5*x) + 0.5
    #   tanh lanes    (g)    : act = 1.0*tanh(1.0*x) + 0.0
    lane = lax.broadcasted_iota(jnp.int32, (1, H4), 1)
    is_g = (lane >= 2 * H) & (lane < 3 * H)
    scale = jnp.where(is_g, 1.0, 0.5).astype(jnp.float32)   # also the output scale
    offs = jnp.where(is_g, 0.0, 0.5).astype(jnp.float32)

    def step(t, carry):
        h, c = carry                                      # (1, H), (1, H) f32
        gates = (xproj_sc[pl.ds(t, 1), :]                 # (1, 4H) f32
                 + jnp.dot(h.astype(jnp.bfloat16), w_hh,
                           preferred_element_type=jnp.float32))
        # One full-width (1, 4H) EUP tanh pass for all four gates.
        y = jnp.tanh(gates * scale)
        act = scale * y + offs                            # i|f|o = sigmoid, g = tanh
        i_g = act[:, 0 * H:1 * H]
        f_g = act[:, 1 * H:2 * H]
        g_g = act[:, 2 * H:3 * H]
        o_g = act[:, 3 * H:4 * H]

        c_new = f_g * c + i_g * g_g
        h_new = o_g * jnp.tanh(c_new)                     # 2nd (and last) EUP pass

        # Store into the resident VMEM output block; single HBM writeback at end.
        out_ref[pl.ds(t, 1), :] = h_new
        return (h_new, c_new)

    h0 = jnp.zeros((1, H), jnp.float32)
    c0 = jnp.zeros((1, H), jnp.float32)
    _, c_fin = lax.fori_loop(0, T, step, (h0, c0), unroll=min(T, 8))

    # Final cell state folded into the last row of the single output block.
    out_ref[pl.ds(T, 1), :] = c_fin


def encoder_forward(ids, emb_table, w_ih_fused, w_hh_fused, bias_fused):
    """ids: (T,) int32; emb_table: (V, E) f32; w_ih_fused: (E, 4H);
    w_hh_fused: (H, 4H); bias_fused: (1, 4H).
    Returns (output (T,1,H), (hidden (1,1,H), cell (1,1,H)))."""
    T = int(ids.shape[0])
    V, E = emb_table.shape
    H = w_hh_fused.shape[0]
    H4 = 4 * H

    # bf16 MXU operands; bias / states / gate math stay f32.
    wih_bf = w_ih_fused.astype(jnp.bfloat16)
    whh_bf = w_hh_fused.astype(jnp.bfloat16)
    bias_f32 = bias_fused.astype(jnp.float32)

    out = pl.pallas_call(
        _encoder_lstm_kernel,
        grid_spec=pltpu.PrefetchScalarGridSpec(
            num_scalar_prefetch=1,                        # ids -> SMEM
            grid=(1,),
            in_specs=[
                pl.BlockSpec(memory_space=pl.ANY),        # embedding table stays in HBM
                pl.BlockSpec((E, H4), lambda i, ids_ref: (0, 0)),
                pl.BlockSpec((H, H4), lambda i, ids_ref: (0, 0)),
                pl.BlockSpec((1, H4), lambda i, ids_ref: (0, 0)),
            ],
            out_specs=pl.BlockSpec((T + 1, H), lambda i, ids_ref: (0, 0)),
            scratch_shapes=[
                pltpu.VMEM((T, E), jnp.float32),          # gathered embeddings
                pltpu.VMEM((T, H4), jnp.float32),         # hoisted X @ W_ih + b
                pltpu.SemaphoreType.DMA((T,)),            # one sem per gathered row
            ],
        ),
        out_shape=jax.ShapeDtypeStruct((T + 1, H), jnp.float32),
        compiler_params=pltpu.CompilerParams(
            dimension_semantics=("arbitrary",)),
    )(ids.astype(jnp.int32), emb_table.astype(jnp.float32),
      wih_bf, whh_bf, bias_f32)

    # Present PyTorch-shaped results (time-major, batch=1).
    output = out[:T].reshape(T, 1, H)
    hidden = out[T - 1:T].reshape(1, 1, H)                # == last per-step h
    cell = out[T:T + 1].reshape(1, 1, H)
    return output, (hidden, cell)


def encoder_reference(ids, emb_table, w_ih_fused, w_hh_fused, bias_fused):
    """Pure-JAX f32 reference LSTM with the same fused layout (gate order i|f|g|o)."""
    H = w_hh_fused.shape[0]
    x = emb_table[ids]                                    # (T, E)

    def step(carry, xt):
        h, c = carry
        gates = xt @ w_ih_fused + h @ w_hh_fused + bias_fused[0]   # (4H,)
        i_g = jax.nn.sigmoid(gates[0 * H:1 * H])
        f_g = jax.nn.sigmoid(gates[1 * H:2 * H])
        g_g = jnp.tanh(gates[2 * H:3 * H])
        o_g = jax.nn.sigmoid(gates[3 * H:4 * H])
        c = f_g * c + i_g * g_g
        h = o_g * jnp.tanh(c)
        return (h, c), h

    (h, c), outs = lax.scan(step, (jnp.zeros((H,)), jnp.zeros((H,))), x)
    return outs, h, c


if __name__ == "__main__":
    # Small, forward-implied shapes.
    input_size = 16      # vocab
    embedding_size = 32
    hidden_size = 32     # -> fused gate width 4H = 128 (lane-dense)
    seq_len = 8

    key = jax.random.PRNGKey(0)
    k_emb, k_wih, k_whh, k_bih, k_bhh, k_ids = jax.random.split(key, 6)

    # Deterministic synthetic parameters.  These correspond to PyTorch's
    # weight_ih_l0.T / weight_hh_l0.T (shape (E,4H)/(H,4H), gate order i,f,g,o)
    # and bias_ih_l0 + bias_hh_l0.
    emb_table = jax.random.normal(k_emb, (input_size, embedding_size), jnp.float32) * 0.1
    w_ih = jax.random.normal(k_wih, (embedding_size, 4 * hidden_size), jnp.float32) * 0.1
    w_hh = jax.random.normal(k_whh, (hidden_size, 4 * hidden_size), jnp.float32) * 0.1
    b_ih = jax.random.normal(k_bih, (1, 4 * hidden_size), jnp.float32) * 0.1
    b_hh = jax.random.normal(k_bhh, (1, 4 * hidden_size), jnp.float32) * 0.1
    bias = b_ih + b_hh

    ids = jax.random.randint(k_ids, (seq_len,), 0, input_size, jnp.int32)

    output, (hidden, cell) = encoder_forward(ids, emb_table, w_ih, w_hh, bias)
    jax.block_until_ready((output, hidden, cell))

    # Sanity check against pure-JAX f32 reference.  Tolerance relaxed because
    # the kernel feeds the MXU bf16 operands (f32 accumulation / state math).
    ref_out, ref_h, ref_c = encoder_reference(ids, emb_table, w_ih, w_hh, bias)
    np.testing.assert_allclose(np.asarray(output[:, 0, :]), np.asarray(ref_out),
                               rtol=2e-2, atol=2e-2)
    np.testing.assert_allclose(np.asarray(hidden[0, 0]), np.asarray(ref_h),
                               rtol=2e-2, atol=2e-2)
    np.testing.assert_allclose(np.asarray(cell[0, 0]), np.asarray(ref_c),
                               rtol=2e-2, atol=2e-2)

    print("KERNEL_OK")
</pallas_src>

<mosaic_0001>
module attributes {stable_mosaic.version = 11 : i64} {
  func.func @_encoder_lstm_kernel(%arg0: i32, %arg1: memref<8xi32, #tpu.memory_space<smem>>, %arg2: memref<16x32xf32, #tpu.memory_space<any>>, %arg3: memref<32x128xbf16, #tpu.memory_space<vmem>>, %arg4: memref<32x128xbf16, #tpu.memory_space<vmem>>, %arg5: memref<1x128xf32, #tpu.memory_space<vmem>>, %arg6: memref<9x32xf32, #tpu.memory_space<vmem>>, %arg7: memref<8x32xf32, #tpu.memory_space<vmem>>, %arg8: memref<8x128xf32, #tpu.memory_space<vmem>>, %arg9: memref<8x!tpu.dma_semaphore, #tpu.memory_space<semaphore_mem>>) attributes {dimension_semantics = [#tpu.dimension_semantics<arbitrary>], iteration_bounds = array<i64: 1>, scalar_prefetch = 1 : i64, scratch_operands = 3 : i64, tpu.core_type = #tpu.core_type<tc>, window_params = [{}, {pipeline_mode = #tpu.pipeline_mode<synchronous>, transform_indices = @transform_1, window_bounds = array<i64: 32, 128>}, {pipeline_mode = #tpu.pipeline_mode<synchronous>, transform_indices = @transform_2, window_bounds = array<i64: 32, 128>}, {pipeline_mode = #tpu.pipeline_mode<synchronous>, transform_indices = @transform_3, window_bounds = array<i64: 1, 128>}, {pipeline_mode = #tpu.pipeline_mode<synchronous>, transform_indices = @transform_4, window_bounds = array<i64: 9, 32>}]} {
    %c0 = arith.constant 0 : index
    %0 = memref.load %arg1[%c0] : memref<8xi32, #tpu.memory_space<smem>>
    %c0_i32 = arith.constant 0 : i32
    %c0_i32_0 = arith.constant 0 : i32
    %1 = tpu.memref_slice %arg2[%0, %c0_i32_0] : memref<16x32xf32, #tpu.memory_space<any>> -> memref<1x32xf32, #tpu.memory_space<any>>
    %c0_i32_1 = arith.constant 0 : i32
    %c0_i32_2 = arith.constant 0 : i32
    %2 = tpu.memref_slice %arg7[%c0_i32_1, %c0_i32_2] : memref<8x32xf32, #tpu.memory_space<vmem>> -> memref<1x32xf32, #tpu.memory_space<vmem>>
    %3 = tpu.memref_slice %arg9[%c0_i32] : memref<8x!tpu.dma_semaphore, #tpu.memory_space<semaphore_mem>> -> memref<1x!tpu.dma_semaphore, #tpu.memory_space<semaphore_mem>>
    %4 = tpu.memref_squeeze %3 : memref<1x!tpu.dma_semaphore, #tpu.memory_space<semaphore_mem>> -> memref<!tpu.dma_semaphore, #tpu.memory_space<semaphore_mem>>
    tpu.enqueue_dma source(%1 : memref<1x32xf32, #tpu.memory_space<any>>) target(%2 : memref<1x32xf32, #tpu.memory_space<vmem>>) target_semaphore(%4 : memref<!tpu.dma_semaphore, #tpu.memory_space<semaphore_mem>>)
    %c1 = arith.constant 1 : index
    %5 = memref.load %arg1[%c1] : memref<8xi32, #tpu.memory_space<smem>>
    %c1_i32 = arith.constant 1 : i32
    %c0_i32_3 = arith.constant 0 : i32
    %6 = tpu.memref_slice %arg2[%5, %c0_i32_3] : memref<16x32xf32, #tpu.memory_space<any>> -> memref<1x32xf32, #tpu.memory_space<any>>
    %c1_i32_4 = arith.constant 1 : i32
    %c0_i32_5 = arith.constant 0 : i32
    %7 = tpu.memref_slice %arg7[%c1_i32_4, %c0_i32_5] : memref<8x32xf32, #tpu.memory_space<vmem>> -> memref<1x32xf32, #tpu.memory_space<vmem>>
    %8 = tpu.memref_slice %arg9[%c1_i32] : memref<8x!tpu.dma_semaphore, #tpu.memory_space<semaphore_mem>> -> memref<1x!tpu.dma_semaphore, #tpu.memory_space<semaphore_mem>>
    %9 = tpu.memref_squeeze %8 : memref<1x!tpu.dma_semaphore, #tpu.memory_space<semaphore_mem>> -> memref<!tpu.dma_semaphore, #tpu.memory_space<semaphore_mem>>
    tpu.enqueue_dma source(%6 : memref<1x32xf32, #tpu.memory_space<any>>) target(%7 : memref<1x32xf32, #tpu.memory_space<vmem>>) target_semaphore(%9 : memref<!tpu.dma_semaphore, #tpu.memory_space<semaphore_mem>>)
    %c2 = arith.constant 2 : index
    %10 = memref.load %arg1[%c2] : memref<8xi32, #tpu.memory_space<smem>>
    %c2_i32 = arith.constant 2 : i32
    %c0_i32_6 = arith.constant 0 : i32
    %11 = tpu.memref_slice %arg2[%10, %c0_i32_6] : memref<16x32xf32, #tpu.memory_space<any>> -> memref<1x32xf32, #tpu.memory_space<any>>
    %c2_i32_7 = arith.constant 2 : i32
    %c0_i32_8 = arith.constant 0 : i32
    %12 = tpu.memref_slice %arg7[%c2_i32_7, %c0_i32_8] : memref<8x32xf32, #tpu.memory_space<vmem>> -> memref<1x32xf32, #tpu.memory_space<vmem>>
    %13 = tpu.memref_slice %arg9[%c2_i32] : memref<8x!tpu.dma_semaphore, #tpu.memory_space<semaphore_mem>> -> memref<1x!tpu.dma_semaphore, #tpu.memory_space<semaphore_mem>>
    %14 = tpu.memref_squeeze %13 : memref<1x!tpu.dma_semaphore, #tpu.memory_space<semaphore_mem>> -> memref<!tpu.dma_semaphore, #tpu.memory_space<semaphore_mem>>
    tpu.enqueue_dma source(%11 : memref<1x32xf32, #tpu.memory_space<any>>) target(%12 : memref<1x32xf32, #tpu.memory_space<vmem>>) target_semaphore(%14 : memref<!tpu.dma_semaphore, #tpu.memory_space<semaphore_mem>>)
    %c3 = arith.constant 3 : index
    %15 = memref.load %arg1[%c3] : memref<8xi32, #tpu.memory_space<smem>>
    %c3_i32 = arith.constant 3 : i32
    %c0_i32_9 = arith.constant 0 : i32
    %16 = tpu.memref_slice %arg2[%15, %c0_i32_9] : memref<16x32xf32, #tpu.memory_space<any>> -> memref<1x32xf32, #tpu.memory_space<any>>
    %c3_i32_10 = arith.constant 3 : i32
    %c0_i32_11 = arith.constant 0 : i32
    %17 = tpu.memref_slice %arg7[%c3_i32_10, %c0_i32_11] : memref<8x32xf32, #tpu.memory_space<vmem>> -> memref<1x32xf32, #tpu.memory_space<vmem>>
    %18 = tpu.memref_slice %arg9[%c3_i32] : memref<8x!tpu.dma_semaphore, #tpu.memory_space<semaphore_mem>> -> memref<1x!tpu.dma_semaphore, #tpu.memory_space<semaphore_mem>>
    %19 = tpu.memref_squeeze %18 : memref<1x!tpu.dma_semaphore, #tpu.memory_space<semaphore_mem>> -> memref<!tpu.dma_semaphore, #tpu.memory_space<semaphore_mem>>
    tpu.enqueue_dma source(%16 : memref<1x32xf32, #tpu.memory_space<any>>) target(%17 : memref<1x32xf32, #tpu.memory_space<vmem>>) target_semaphore(%19 : memref<!tpu.dma_semaphore, #tpu.memory_space<semaphore_mem>>)
    %c4 = arith.constant 4 : index
    %20 = memref.load %arg1[%c4] : memref<8xi32, #tpu.memory_space<smem>>
    %c4_i32 = arith.constant 4 : i32
    %c0_i32_12 = arith.constant 0 : i32
    %21 = tpu.memref_slice %arg2[%20, %c0_i32_12] : memref<16x32xf32, #tpu.memory_space<any>> -> memref<1x32xf32, #tpu.memory_space<any>>
    %c4_i32_13 = arith.constant 4 : i32
    %c0_i32_14 = arith.constant 0 : i32
    %22 = tpu.memref_slice %arg7[%c4_i32_13, %c0_i32_14] : memref<8x32xf32, #tpu.memory_space<vmem>> -> memref<1x32xf32, #tpu.memory_space<vmem>>
    %23 = tpu.memref_slice %arg9[%c4_i32] : memref<8x!tpu.dma_semaphore, #tpu.memory_space<semaphore_mem>> -> memref<1x!tpu.dma_semaphore, #tpu.memory_space<semaphore_mem>>
    %24 = tpu.memref_squeeze %23 : memref<1x!tpu.dma_semaphore, #tpu.memory_space<semaphore_mem>> -> memref<!tpu.dma_semaphore, #tpu.memory_space<semaphore_mem>>
    tpu.enqueue_dma source(%21 : memref<1x32xf32, #tpu.memory_space<any>>) target(%22 : memref<1x32xf32, #tpu.memory_space<vmem>>) target_semaphore(%24 : memref<!tpu.dma_semaphore, #tpu.memory_space<semaphore_mem>>)
    %c5 = arith.constant 5 : index
    %25 = memref.load %arg1[%c5] : memref<8xi32, #tpu.memory_space<smem>>
    %c5_i32 = arith.constant 5 : i32
    %c0_i32_15 = arith.constant 0 : i32
    %26 = tpu.memref_slice %arg2[%25, %c0_i32_15] : memref<16x32xf32, #tpu.memory_space<any>> -> memref<1x32xf32, #tpu.memory_space<any>>
    %c5_i32_16 = arith.constant 5 : i32
    %c0_i32_17 = arith.constant 0 : i32
    %27 = tpu.memref_slice %arg7[%c5_i32_16, %c0_i32_17] : memref<8x32xf32, #tpu.memory_space<vmem>> -> memref<1x32xf32, #tpu.memory_space<vmem>>
    %28 = tpu.memref_slice %arg9[%c5_i32] : memref<8x!tpu.dma_semaphore, #tpu.memory_space<semaphore_mem>> -> memref<1x!tpu.dma_semaphore, #tpu.memory_space<semaphore_mem>>
    %29 = tpu.memref_squeeze %28 : memref<1x!tpu.dma_semaphore, #tpu.memory_space<semaphore_mem>> -> memref<!tpu.dma_semaphore, #tpu.memory_space<semaphore_mem>>
    tpu.enqueue_dma source(%26 : memref<1x32xf32, #tpu.memory_space<any>>) target(%27 : memref<1x32xf32, #tpu.memory_space<vmem>>) target_semaphore(%29 : memref<!tpu.dma_semaphore, #tpu.memory_space<semaphore_mem>>)
    %c6 = arith.constant 6 : index
    %30 = memref.load %arg1[%c6] : memref<8xi32, #tpu.memory_space<smem>>
    %c6_i32 = arith.constant 6 : i32
    %c0_i32_18 = arith.constant 0 : i32
    %31 = tpu.memref_slice %arg2[%30, %c0_i32_18] : memref<16x32xf32, #tpu.memory_space<any>> -> memref<1x32xf32, #tpu.memory_space<any>>
    %c6_i32_19 = arith.constant 6 : i32
    %c0_i32_20 = arith.constant 0 : i32
    %32 = tpu.memref_slice %arg7[%c6_i32_19, %c0_i32_20] : memref<8x32xf32, #tpu.memory_space<vmem>> -> memref<1x32xf32, #tpu.memory_space<vmem>>
    %33 = tpu.memref_slice %arg9[%c6_i32] : memref<8x!tpu.dma_semaphore, #tpu.memory_space<semaphore_mem>> -> memref<1x!tpu.dma_semaphore, #tpu.memory_space<semaphore_mem>>
    %34 = tpu.memref_squeeze %33 : memref<1x!tpu.dma_semaphore, #tpu.memory_space<semaphore_mem>> -> memref<!tpu.dma_semaphore, #tpu.memory_space<semaphore_mem>>
    tpu.enqueue_dma source(%31 : memref<1x32xf32, #tpu.memory_space<any>>) target(%32 : memref<1x32xf32, #tpu.memory_space<vmem>>) target_semaphore(%34 : memref<!tpu.dma_semaphore, #tpu.memory_space<semaphore_mem>>)
    %c7 = arith.constant 7 : index
    %35 = memref.load %arg1[%c7] : memref<8xi32, #tpu.memory_space<smem>>
    %c7_i32 = arith.constant 7 : i32
    %c0_i32_21 = arith.constant 0 : i32
    %36 = tpu.memref_slice %arg2[%35, %c0_i32_21] : memref<16x32xf32, #tpu.memory_space<any>> -> memref<1x32xf32, #tpu.memory_space<any>>
    %c7_i32_22 = arith.constant 7 : i32
    %c0_i32_23 = arith.constant 0 : i32
    %37 = tpu.memref_slice %arg7[%c7_i32_22, %c0_i32_23] : memref<8x32xf32, #tpu.memory_space<vmem>> -> memref<1x32xf32, #tpu.memory_space<vmem>>
    %38 = tpu.memref_slice %arg9[%c7_i32] : memref<8x!tpu.dma_semaphore, #tpu.memory_space<semaphore_mem>> -> memref<1x!tpu.dma_semaphore, #tpu.memory_space<semaphore_mem>>
    %39 = tpu.memref_squeeze %38 : memref<1x!tpu.dma_semaphore, #tpu.memory_space<semaphore_mem>> -> memref<!tpu.dma_semaphore, #tpu.memory_space<semaphore_mem>>
    tpu.enqueue_dma source(%36 : memref<1x32xf32, #tpu.memory_space<any>>) target(%37 : memref<1x32xf32, #tpu.memory_space<vmem>>) target_semaphore(%39 : memref<!tpu.dma_semaphore, #tpu.memory_space<semaphore_mem>>)
    %c0_i32_24 = arith.constant 0 : i32
    %c0_i32_25 = arith.constant 0 : i32
    %40 = tpu.memref_slice %arg2[%0, %c0_i32_25] : memref<16x32xf32, #tpu.memory_space<any>> -> memref<1x32xf32, #tpu.memory_space<any>>
    %c0_i32_26 = arith.constant 0 : i32
    %c0_i32_27 = arith.constant 0 : i32
    %41 = tpu.memref_slice %arg7[%c0_i32_26, %c0_i32_27] : memref<8x32xf32, #tpu.memory_space<vmem>> -> memref<1x32xf32, #tpu.memory_space<vmem>>
    %42 = tpu.memref_slice %arg9[%c0_i32_24] : memref<8x!tpu.dma_semaphore, #tpu.memory_space<semaphore_mem>> -> memref<1x!tpu.dma_semaphore, #tpu.memory_space<semaphore_mem>>
    %43 = tpu.memref_squeeze %42 : memref<1x!tpu.dma_semaphore, #tpu.memory_space<semaphore_mem>> -> memref<!tpu.dma_semaphore, #tpu.memory_space<semaphore_mem>>
    tpu.wait_dma2 semaphore(%43 : memref<!tpu.dma_semaphore, #tpu.memory_space<semaphore_mem>>) src(%40 : memref<1x32xf32, #tpu.memory_space<any>>) dst(%41 : memref<1x32xf32, #tpu.memory_space<vmem>>)
    %c1_i32_28 = arith.constant 1 : i32
    %c0_i32_29 = arith.constant 0 : i32
    %44 = tpu.memref_slice %arg2[%5, %c0_i32_29] : memref<16x32xf32, #tpu.memory_space<any>> -> memref<1x32xf32, #tpu.memory_space<any>>
    %c1_i32_30 = arith.constant 1 : i32
    %c0_i32_31 = arith.constant 0 : i32
    %45 = tpu.memref_slice %arg7[%c1_i32_30, %c0_i32_31] : memref<8x32xf32, #tpu.memory_space<vmem>> -> memref<1x32xf32, #tpu.memory_space<vmem>>
    %46 = tpu.memref_slice %arg9[%c1_i32_28] : memref<8x!tpu.dma_semaphore, #tpu.memory_space<semaphore_mem>> -> memref<1x!tpu.dma_semaphore, #tpu.memory_space<semaphore_mem>>
    %47 = tpu.memref_squeeze %46 : memref<1x!tpu.dma_semaphore, #tpu.memory_space<semaphore_mem>> -> memref<!tpu.dma_semaphore, #tpu.memory_space<semaphore_mem>>
    tpu.wait_dma2 semaphore(%47 : memref<!tpu.dma_semaphore, #tpu.memory_space<semaphore_mem>>) src(%44 : memref<1x32xf32, #tpu.memory_space<any>>) dst(%45 : memref<1x32xf32, #tpu.memory_space<vmem>>)
    %c2_i32_32 = arith.constant 2 : i32
    %c0_i32_33 = arith.constant 0 : i32
    %48 = tpu.memref_slice %arg2[%10, %c0_i32_33] : memref<16x32xf32, #tpu.memory_space<any>> -> memref<1x32xf32, #tpu.memory_space<any>>
    %c2_i32_34 = arith.constant 2 : i32
    %c0_i32_35 = arith.constant 0 : i32
    %49 = tpu.memref_slice %arg7[%c2_i32_34, %c0_i32_35] : memref<8x32xf32, #tpu.memory_space<vmem>> -> memref<1x32xf32, #tpu.memory_space<vmem>>
    %50 = tpu.memref_slice %arg9[%c2_i32_32] : memref<8x!tpu.dma_semaphore, #tpu.memory_space<semaphore_mem>> -> memref<1x!tpu.dma_semaphore, #tpu.memory_space<semaphore_mem>>
    %51 = tpu.memref_squeeze %50 : memref<1x!tpu.dma_semaphore, #tpu.memory_space<semaphore_mem>> -> memref<!tpu.dma_semaphore, #tpu.memory_space<semaphore_mem>>
    tpu.wait_dma2 semaphore(%51 : memref<!tpu.dma_semaphore, #tpu.memory_space<semaphore_mem>>) src(%48 : memref<1x32xf32, #tpu.memory_space<any>>) dst(%49 : memref<1x32xf32, #tpu.memory_space<vmem>>)
    %c3_i32_36 = arith.constant 3 : i32
    %c0_i32_37 = arith.constant 0 : i32
    %52 = tpu.memref_slice %arg2[%15, %c0_i32_37] : memref<16x32xf32, #tpu.memory_space<any>> -> memref<1x32xf32, #tpu.memory_space<any>>
    %c3_i32_38 = arith.constant 3 : i32
    %c0_i32_39 = arith.constant 0 : i32
    %53 = tpu.memref_slice %arg7[%c3_i32_38, %c0_i32_39] : memref<8x32xf32, #tpu.memory_space<vmem>> -> memref<1x32xf32, #tpu.memory_space<vmem>>
    %54 = tpu.memref_slice %arg9[%c3_i32_36] : memref<8x!tpu.dma_semaphore, #tpu.memory_space<semaphore_mem>> -> memref<1x!tpu.dma_semaphore, #tpu.memory_space<semaphore_mem>>
    %55 = tpu.memref_squeeze %54 : memref<1x!tpu.dma_semaphore, #tpu.memory_space<semaphore_mem>> -> memref<!tpu.dma_semaphore, #tpu.memory_space<semaphore_mem>>
    tpu.wait_dma2 semaphore(%55 : memref<!tpu.dma_semaphore, #tpu.memory_space<semaphore_mem>>) src(%52 : memref<1x32xf32, #tpu.memory_space<any>>) dst(%53 : memref<1x32xf32, #tpu.memory_space<vmem>>)
    %c4_i32_40 = arith.constant 4 : i32
    %c0_i32_41 = arith.constant 0 : i32
    %56 = tpu.memref_slice %arg2[%20, %c0_i32_41] : memref<16x32xf32, #tpu.memory_space<any>> -> memref<1x32xf32, #tpu.memory_space<any>>
    %c4_i32_42 = arith.constant 4 : i32
    %c0_i32_43 = arith.constant 0 : i32
    %57 = tpu.memref_slice %arg7[%c4_i32_42, %c0_i32_43] : memref<8x32xf32, #tpu.memory_space<vmem>> -> memref<1x32xf32, #tpu.memory_space<vmem>>
    %58 = tpu.memref_slice %arg9[%c4_i32_40] : memref<8x!tpu.dma_semaphore, #tpu.memory_space<semaphore_mem>> -> memref<1x!tpu.dma_semaphore, #tpu.memory_space<semaphore_mem>>
    %59 = tpu.memref_squeeze %58 : memref<1x!tpu.dma_semaphore, #tpu.memory_space<semaphore_mem>> -> memref<!tpu.dma_semaphore, #tpu.memory_space<semaphore_mem>>
    tpu.wait_dma2 semaphore(%59 : memref<!tpu.dma_semaphore, #tpu.memory_space<semaphore_mem>>) src(%56 : memref<1x32xf32, #tpu.memory_space<any>>) dst(%57 : memref<1x32xf32, #tpu.memory_space<vmem>>)
    %c5_i32_44 = arith.constant 5 : i32
    %c0_i32_45 = arith.constant 0 : i32
    %60 = tpu.memref_slice %arg2[%25, %c0_i32_45] : memref<16x32xf32, #tpu.memory_space<any>> -> memref<1x32xf32, #tpu.memory_space<any>>
    %c5_i32_46 = arith.constant 5 : i32
    %c0_i32_47 = arith.constant 0 : i32
    %61 = tpu.memref_slice %arg7[%c5_i32_46, %c0_i32_47] : memref<8x32xf32, #tpu.memory_space<vmem>> -> memref<1x32xf32, #tpu.memory_space<vmem>>
    %62 = tpu.memref_slice %arg9[%c5_i32_44] : memref<8x!tpu.dma_semaphore, #tpu.memory_space<semaphore_mem>> -> memref<1x!tpu.dma_semaphore, #tpu.memory_space<semaphore_mem>>
    %63 = tpu.memref_squeeze %62 : memref<1x!tpu.dma_semaphore, #tpu.memory_space<semaphore_mem>> -> memref<!tpu.dma_semaphore, #tpu.memory_space<semaphore_mem>>
    tpu.wait_dma2 semaphore(%63 : memref<!tpu.dma_semaphore, #tpu.memory_space<semaphore_mem>>) src(%60 : memref<1x32xf32, #tpu.memory_space<any>>) dst(%61 : memref<1x32xf32, #tpu.memory_space<vmem>>)
    %c6_i32_48 = arith.constant 6 : i32
    %c0_i32_49 = arith.constant 0 : i32
    %64 = tpu.memref_slice %arg2[%30, %c0_i32_49] : memref<16x32xf32, #tpu.memory_space<any>> -> memref<1x32xf32, #tpu.memory_space<any>>
    %c6_i32_50 = arith.constant 6 : i32
    %c0_i32_51 = arith.constant 0 : i32
    %65 = tpu.memref_slice %arg7[%c6_i32_50, %c0_i32_51] : memref<8x32xf32, #tpu.memory_space<vmem>> -> memref<1x32xf32, #tpu.memory_space<vmem>>
    %66 = tpu.memref_slice %arg9[%c6_i32_48] : memref<8x!tpu.dma_semaphore, #tpu.memory_space<semaphore_mem>> -> memref<1x!tpu.dma_semaphore, #tpu.memory_space<semaphore_mem>>
    %67 = tpu.memref_squeeze %66 : memref<1x!tpu.dma_semaphore, #tpu.memory_space<semaphore_mem>> -> memref<!tpu.dma_semaphore, #tpu.memory_space<semaphore_mem>>
    tpu.wait_dma2 semaphore(%67 : memref<!tpu.dma_semaphore, #tpu.memory_space<semaphore_mem>>) src(%64 : memref<1x32xf32, #tpu.memory_space<any>>) dst(%65 : memref<1x32xf32, #tpu.memory_space<vmem>>)
    %c7_i32_52 = arith.constant 7 : i32
    %c0_i32_53 = arith.constant 0 : i32
    %68 = tpu.memref_slice %arg2[%35, %c0_i32_53] : memref<16x32xf32, #tpu.memory_space<any>> -> memref<1x32xf32, #tpu.memory_space<any>>
    %c7_i32_54 = arith.constant 7 : i32
    %c0_i32_55 = arith.constant 0 : i32
    %69 = tpu.memref_slice %arg7[%c7_i32_54, %c0_i32_55] : memref<8x32xf32, #tpu.memory_space<vmem>> -> memref<1x32xf32, #tpu.memory_space<vmem>>
    %70 = tpu.memref_slice %arg9[%c7_i32_52] : memref<8x!tpu.dma_semaphore, #tpu.memory_space<semaphore_mem>> -> memref<1x!tpu.dma_semaphore, #tpu.memory_space<semaphore_mem>>
    %71 = tpu.memref_squeeze %70 : memref<1x!tpu.dma_semaphore, #tpu.memory_space<semaphore_mem>> -> memref<!tpu.dma_semaphore, #tpu.memory_space<semaphore_mem>>
    tpu.wait_dma2 semaphore(%71 : memref<!tpu.dma_semaphore, #tpu.memory_space<semaphore_mem>>) src(%68 : memref<1x32xf32, #tpu.memory_space<any>>) dst(%69 : memref<1x32xf32, #tpu.memory_space<vmem>>)
    %c0_56 = arith.constant 0 : index
    %c0_57 = arith.constant 0 : index
    %72 = vector.load %arg7[%c0_56, %c0_57] : memref<8x32xf32, #tpu.memory_space<vmem>>, vector<8x32xf32>
    %73 = arith.truncf %72 : vector<8x32xf32> to vector<8x32xbf16>
    %c0_58 = arith.constant 0 : index
    %c0_59 = arith.constant 0 : index
    %74 = vector.load %arg3[%c0_58, %c0_59] : memref<32x128xbf16, #tpu.memory_space<vmem>>, vector<32x128xbf16>
    %cst = arith.constant dense<0.000000e+00> : vector<8x128xf32>
    %75 = tpu.matmul %73, %74, %cst {dimension_numbers = #tpu.dot_dimension_numbers<[1], [0], [0], [1], [0, 0, 1, 1], [], []>} : vector<8x32xbf16>, vector<32x128xbf16>, vector<8x128xf32> -> vector<8x128xf32>
    %c0_60 = arith.constant 0 : index
    %c0_61 = arith.constant 0 : index
    %76 = vector.load %arg5[%c0_60, %c0_61] : memref<1x128xf32, #tpu.memory_space<vmem>>, vector<1x128xf32>
    %77 = vector.broadcast %76 : vector<1x128xf32> to vector<8x128xf32>
    %78 = arith.addf %75, %77 : vector<8x128xf32>
    %c0_62 = arith.constant 0 : index
    %c0_63 = arith.constant 0 : index
    %79 = vector.load %arg8[%c0_62, %c0_63] : memref<8x128xf32, #tpu.memory_space<vmem>>, vector<8x128xf32>
    tpu.vector_store %arg8[%c0_62, %c0_63], %78 {strides = array<i32>} : memref<8x128xf32, #tpu.memory_space<vmem>>, vector<8x128xf32>,
    %c0_64 = arith.constant 0 : index
    %c0_65 = arith.constant 0 : index
    %80 = vector.load %arg4[%c0_64, %c0_65] : memref<32x128xbf16, #tpu.memory_space<vmem>>, vector<32x128xbf16>
    %81 = tpu.iota {dimensions = array<i32: 1>} : vector<1x128xi32>
    %c64_i32 = arith.constant 64 : i32
    %82 = vector.broadcast %c64_i32 : i32 to vector<1x128xi32>
    %83 = arith.cmpi sge, %81, %82 : vector<1x128xi32>
    %c96_i32 = arith.constant 96 : i32
    %84 = vector.broadcast %c96_i32 : i32 to vector<1x128xi32>
    %85 = arith.cmpi slt, %81, %84 : vector<1x128xi32>
    %86 = arith.andi %83, %85 : vector<1x128xi1>
    %cst_66 = arith.constant 1.000000e+00 : f32
    %cst_67 = arith.constant 5.000000e-01 : f32
    %87 = vector.broadcast %cst_66 : f32 to vector<1x128xf32>
    %88 = vector.broadcast %cst_67 : f32 to vector<1x128xf32>
    %89 = arith.select %86, %87, %88 : vector<1x128xi1>, vector<1x128xf32>
    %cst_68 = arith.constant 0.000000e+00 : f32
    %cst_69 = arith.constant 5.000000e-01 : f32
    %90 = vector.broadcast %cst_68 : f32 to vector<1x128xf32>
    %91 = vector.broadcast %cst_69 : f32 to vector<1x128xf32>
    %92 = arith.select %86, %90, %91 : vector<1x128xi1>, vector<1x128xf32>
    %cst_70 = arith.constant 0.000000e+00 : f32
    %93 = vector.broadcast %cst_70 : f32 to vector<1x32xf32>
    %cst_71 = arith.constant 0.000000e+00 : f32
    %94 = vector.broadcast %cst_71 : f32 to vector<1x32xf32>
    %c0_i32_72 = arith.constant 0 : i32
    %95 = arith.index_cast %c0_i32_72 : i32 to index
    %c0_73 = arith.constant 0 : index
    %96 = vector.load %arg8[%95, %c0_73] : memref<8x128xf32, #tpu.memory_space<vmem>>, vector<1x128xf32>
    %97 = arith.truncf %93 : vector<1x32xf32> to vector<1x32xbf16>
    %cst_74 = arith.constant dense<0.000000e+00> : vector<1x128xf32>
    %98 = tpu.matmul %97, %80, %cst_74 {dimension_numbers = #tpu.dot_dimension_numbers<[1], [0], [0], [1], [0, 0, 1, 1], [], []>} : vector<1x32xbf16>, vector<32x128xbf16>, vector<1x128xf32> -> vector<1x128xf32>
    %99 = arith.addf %96, %98 : vector<1x128xf32>
    %100 = arith.mulf %99, %89 : vector<1x128xf32>
    %101 = math.tanh %100 : vector<1x128xf32>
    %102 = arith.mulf %89, %101 : vector<1x128xf32>
    %103 = arith.addf %102, %92 : vector<1x128xf32>
    %104 = vector.extract_strided_slice %103 {offsets = [0, 0], sizes = [1, 32], strides = [1, 1]} : vector<1x128xf32> to vector<1x32xf32>
    %105 = vector.extract_strided_slice %103 {offsets = [0, 32], sizes = [1, 32], strides = [1, 1]} : vector<1x128xf32> to vector<1x32xf32>
    %106 = vector.extract_strided_slice %103 {offsets = [0, 64], sizes = [1, 32], strides = [1, 1]} : vector<1x128xf32> to vector<1x32xf32>
    %107 = vector.extract_strided_slice %103 {offsets = [0, 96], sizes = [1, 32], strides = [1, 1]} : vector<1x128xf32> to vector<1x32xf32>
    %108 = arith.mulf %105, %94 : vector<1x32xf32>
    %109 = arith.mulf %104, %106 : vector<1x32xf32>
    %110 = arith.addf %108, %109 : vector<1x32xf32>
    %111 = math.tanh %110 : vector<1x32xf32>
    %112 = arith.mulf %107, %111 : vector<1x32xf32>
    %113 = arith.index_cast %c0_i32_72 : i32 to index
    %c0_75 = arith.constant 0 : index
    %114 = vector.load %arg6[%113, %c0_75] : memref<9x32xf32, #tpu.memory_space<vmem>>, vector<1x32xf32>
    tpu.vector_store %arg6[%113, %c0_75], %112 {strides = array<i32>} : memref<9x32xf32, #tpu.memory_space<vmem>>, vector<1x32xf32>,
    %c1_i32_76 = arith.constant 1 : i32
    %115 = arith.index_cast %c1_i32_76 : i32 to index
    %c0_77 = arith.constant 0 : index
    %116 = vector.load %arg8[%115, %c0_77] : memref<8x128xf32, #tpu.memory_space<vmem>>, vector<1x128xf32>
    %117 = arith.truncf %112 : vector<1x32xf32> to vector<1x32xbf16>
    %cst_78 = arith.constant dense<0.000000e+00> : vector<1x128xf32>
    %118 = tpu.matmul %117, %80, %cst_78 {dimension_numbers = #tpu.dot_dimension_numbers<[1], [0], [0], [1], [0, 0, 1, 1], [], []>} : vector<1x32xbf16>, vector<32x128xbf16>, vector<1x128xf32> -> vector<1x128xf32>
    %119 = arith.addf %116, %118 : vector<1x128xf32>
    %120 = arith.mulf %119, %89 : vector<1x128xf32>
    %121 = math.tanh %120 : vector<1x128xf32>
    %122 = arith.mulf %89, %121 : vector<1x128xf32>
    %123 = arith.addf %122, %92 : vector<1x128xf32>
    %124 = vector.extract_strided_slice %123 {offsets = [0, 0], sizes = [1, 32], strides = [1, 1]} : vector<1x128xf32> to vector<1x32xf32>
    %125 = vector.extract_strided_slice %123 {offsets = [0, 32], sizes = [1, 32], strides = [1, 1]} : vector<1x128xf32> to vector<1x32xf32>
    %126 = vector.extract_strided_slice %123 {offsets = [0, 64], sizes = [1, 32], strides = [1, 1]} : vector<1x128xf32> to vector<1x32xf32>
    %127 = vector.extract_strided_slice %123 {offsets = [0, 96], sizes = [1, 32], strides = [1, 1]} : vector<1x128xf32> to vector<1x32xf32>
    %128 = arith.mulf %125, %110 : vector<1x32xf32>
    %129 = arith.mulf %124, %126 : vector<1x32xf32>
    %130 = arith.addf %128, %129 : vector<1x32xf32>
    %131 = math.tanh %130 : vector<1x32xf32>
    %132 = arith.mulf %127, %131 : vector<1x32xf32>
    %133 = arith.index_cast %c1_i32_76 : i32 to index
    %c0_79 = arith.constant 0 : index
    %134 = vector.load %arg6[%133, %c0_79] : memref<9x32xf32, #tpu.memory_space<vmem>>, vector<1x32xf32>
    tpu.vector_store %arg6[%133, %c0_79], %132 {strides = array<i32>} : memref<9x32xf32, #tpu.memory_space<vmem>>, vector<1x32xf32>,
    %c2_i32_80 = arith.constant 2 : i32
    %135 = arith.index_cast %c2_i32_80 : i32 to index
    %c0_81 = arith.constant 0 : index
    %136 = vector.load %arg8[%135, %c0_81] : memref<8x128xf32, #tpu.memory_space<vmem>>, vector<1x128xf32>
    %137 = arith.truncf %132 : vector<1x32xf32> to vector<1x32xbf16>
    %cst_82 = arith.constant dense<0.000000e+00> : vector<1x128xf32>
    %138 = tpu.matmul %137, %80, %cst_82 {dimension_numbers = #tpu.dot_dimension_numbers<[1], [0], [0], [1], [0, 0, 1, 1], [], []>} : vector<1x32xbf16>, vector<32x128xbf16>, vector<1x128xf32> -> vector<1x128xf32>
    %139 = arith.addf %136, %138 : vector<1x128xf32>
    %140 = arith.mulf %139, %89 : vector<1x128xf32>
    %141 = math.tanh %140 : vector<1x128xf32>
    %142 = arith.mulf %89, %141 : vector<1x128xf32>
    %143 = arith.addf %142, %92 : vector<1x128xf32>
    %144 = vector.extract_strided_slice %143 {offsets = [0, 0], sizes = [1, 32], strides = [1, 1]} : vector<1x128xf32> to vector<1x32xf32>
    %145 = vector.extract_strided_slice %143 {offsets = [0, 32], sizes = [1, 32], strides = [1, 1]} : vector<1x128xf32> to vector<1x32xf32>
    %146 = vector.extract_strided_slice %143 {offsets = [0, 64], sizes = [1, 32], strides = [1, 1]} : vector<1x128xf32> to vector<1x32xf32>
    %147 = vector.extract_strided_slice %143 {offsets = [0, 96], sizes = [1, 32], strides = [1, 1]} : vector<1x128xf32> to vector<1x32xf32>
    %148 = arith.mulf %145, %130 : vector<1x32xf32>
    %149 = arith.mulf %144, %146 : vector<1x32xf32>
    %150 = arith.addf %148, %149 : vector<1x32xf32>
    %151 = math.tanh %150 : vector<1x32xf32>
    %152 = arith.mulf %147, %151 : vector<1x32xf32>
    %153 = arith.index_cast %c2_i32_80 : i32 to index
    %c0_83 = arith.constant 0 : index
    %154 = vector.load %arg6[%153, %c0_83] : memref<9x32xf32, #tpu.memory_space<vmem>>, vector<1x32xf32>
    tpu.vector_store %arg6[%153, %c0_83], %152 {strides = array<i32>} : memref<9x32xf32, #tpu.memory_space<vmem>>, vector<1x32xf32>,
    %c3_i32_84 = arith.constant 3 : i32
    %155 = arith.index_cast %c3_i32_84 : i32 to index
    %c0_85 = arith.constant 0 : index
    %156 = vector.load %arg8[%155, %c0_85] : memref<8x128xf32, #tpu.memory_space<vmem>>, vector<1x128xf32>
    %157 = arith.truncf %152 : vector<1x32xf32> to vector<1x32xbf16>
    %cst_86 = arith.constant dense<0.000000e+00> : vector<1x128xf32>
    %158 = tpu.matmul %157, %80, %cst_86 {dimension_numbers = #tpu.dot_dimension_numbers<[1], [0], [0], [1], [0, 0, 1, 1], [], []>} : vector<1x32xbf16>, vector<32x128xbf16>, vector<1x128xf32> -> vector<1x128xf32>
    %159 = arith.addf %156, %158 : vector<1x128xf32>
    %160 = arith.mulf %159, %89 : vector<1x128xf32>
    %161 = math.tanh %160 : vector<1x128xf32>
    %162 = arith.mulf %89, %161 : vector<1x128xf32>
    %163 = arith.addf %162, %92 : vector<1x128xf32>
    %164 = vector.extract_strided_slice %163 {offsets = [0, 0], sizes = [1, 32], strides = [1, 1]} : vector<1x128xf32> to vector<1x32xf32>
    %165 = vector.extract_strided_slice %163 {offsets = [0, 32], sizes = [1, 32], strides = [1, 1]} : vector<1x128xf32> to vector<1x32xf32>
    %166 = vector.extract_strided_slice %163 {offsets = [0, 64], sizes = [1, 32], strides = [1, 1]} : vector<1x128xf32> to vector<1x32xf32>
    %167 = vector.extract_strided_slice %163 {offsets = [0, 96], sizes = [1, 32], strides = [1, 1]} : vector<1x128xf32> to vector<1x32xf32>
    %168 = arith.mulf %165, %150 : vector<1x32xf32>
    %169 = arith.mulf %164, %166 : vector<1x32xf32>
    %170 = arith.addf %168, %169 : vector<1x32xf32>
    %171 = math.tanh %170 : vector<1x32xf32>
    %172 = arith.mulf %167, %171 : vector<1x32xf32>
    %173 = arith.index_cast %c3_i32_84 : i32 to index
    %c0_87 = arith.constant 0 : index
    %174 = vector.load %arg6[%173, %c0_87] : memref<9x32xf32, #tpu.memory_space<vmem>>, vector<1x32xf32>
    tpu.vector_store %arg6[%173, %c0_87], %172 {strides = array<i32>} : memref<9x32xf32, #tpu.memory_space<vmem>>, vector<1x32xf32>,
    %c4_i32_88 = arith.constant 4 : i32
    %175 = arith.index_cast %c4_i32_88 : i32 to index
    %c0_89 = arith.constant 0 : index
    %176 = vector.load %arg8[%175, %c0_89] : memref<8x128xf32, #tpu.memory_space<vmem>>, vector<1x128xf32>
    %177 = arith.truncf %172 : vector<1x32xf32> to vector<1x32xbf16>
    %cst_90 = arith.constant dense<0.000000e+00> : vector<1x128xf32>
    %178 = tpu.matmul %177, %80, %cst_90 {dimension_numbers = #tpu.dot_dimension_numbers<[1], [0], [0], [1], [0, 0, 1, 1], [], []>} : vector<1x32xbf16>, vector<32x128xbf16>, vector<1x128xf32> -> vector<1x128xf32>
    %179 = arith.addf %176, %178 : vector<1x128xf32>
    %180 = arith.mulf %179, %89 : vector<1x128xf32>
    %181 = math.tanh %180 : vector<1x128xf32>
    %182 = arith.mulf %89, %181 : vector<1x128xf32>
    %183 = arith.addf %182, %92 : vector<1x128xf32>
    %184 = vector.extract_strided_slice %183 {offsets = [0, 0], sizes = [1, 32], strides = [1, 1]} : vector<1x128xf32> to vector<1x32xf32>
    %185 = vector.extract_strided_slice %183 {offsets = [0, 32], sizes = [1, 32], strides = [1, 1]} : vector<1x128xf32> to vector<1x32xf32>
    %186 = vector.extract_strided_slice %183 {offsets = [0, 64], sizes = [1, 32], strides = [1, 1]} : vector<1x128xf32> to vector<1x32xf32>
    %187 = vector.extract_strided_slice %183 {offsets = [0, 96], sizes = [1, 32], strides = [1, 1]} : vector<1x128xf32> to vector<1x32xf32>
    %188 = arith.mulf %185, %170 : vector<1x32xf32>
    %189 = arith.mulf %184, %186 : vector<1x32xf32>
    %190 = arith.addf %188, %189 : vector<1x32xf32>
    %191 = math.tanh %190 : vector<1x32xf32>
    %192 = arith.mulf %187, %191 : vector<1x32xf32>
    %193 = arith.index_cast %c4_i32_88 : i32 to index
    %c0_91 = arith.constant 0 : index
    %194 = vector.load %arg6[%193, %c0_91] : memref<9x32xf32, #tpu.memory_space<vmem>>, vector<1x32xf32>
    tpu.vector_store %arg6[%193, %c0_91], %192 {strides = array<i32>} : memref<9x32xf32, #tpu.memory_space<vmem>>, vector<1x32xf32>,
    %c5_i32_92 = arith.constant 5 : i32
    %195 = arith.index_cast %c5_i32_92 : i32 to index
    %c0_93 = arith.constant 0 : index
    %196 = vector.load %arg8[%195, %c0_93] : memref<8x128xf32, #tpu.memory_space<vmem>>, vector<1x128xf32>
    %197 = arith.truncf %192 : vector<1x32xf32> to vector<1x32xbf16>
    %cst_94 = arith.constant dense<0.000000e+00> : vector<1x128xf32>
    %198 = tpu.matmul %197, %80, %cst_94 {dimension_numbers = #tpu.dot_dimension_numbers<[1], [0], [0], [1], [0, 0, 1, 1], [], []>} : vector<1x32xbf16>, vector<32x128xbf16>, vector<1x128xf32> -> vector<1x128xf32>
    %199 = arith.addf %196, %198 : vector<1x128xf32>
    %200 = arith.mulf %199, %89 : vector<1x128xf32>
    %201 = math.tanh %200 : vector<1x128xf32>
    %202 = arith.mulf %89, %201 : vector<1x128xf32>
    %203 = arith.addf %202, %92 : vector<1x128xf32>
    %204 = vector.extract_strided_slice %203 {offsets = [0, 0], sizes = [1, 32], strides = [1, 1]} : vector<1x128xf32> to vector<1x32xf32>
    %205 = vector.extract_strided_slice %203 {offsets = [0, 32], sizes = [1, 32], strides = [1, 1]} : vector<1x128xf32> to vector<1x32xf32>
    %206 = vector.extract_strided_slice %203 {offsets = [0, 64], sizes = [1, 32], strides = [1, 1]} : vector<1x128xf32> to vector<1x32xf32>
    %207 = vector.extract_strided_slice %203 {offsets = [0, 96], sizes = [1, 32], strides = [1, 1]} : vector<1x128xf32> to vector<1x32xf32>
    %208 = arith.mulf %205, %190 : vector<1x32xf32>
    %209 = arith.mulf %204, %206 : vector<1x32xf32>
    %210 = arith.addf %208, %209 : vector<1x32xf32>
    %211 = math.tanh %210 : vector<1x32xf32>
    %212 = arith.mulf %207, %211 : vector<1x32xf32>
    %213 = arith.index_cast %c5_i32_92 : i32 to index
    %c0_95 = arith.constant 0 : index
    %214 = vector.load %arg6[%213, %c0_95] : memref<9x32xf32, #tpu.memory_space<vmem>>, vector<1x32xf32>
    tpu.vector_store %arg6[%213, %c0_95], %212 {strides = array<i32>} : memref<9x32xf32, #tpu.memory_space<vmem>>, vector<1x32xf32>,
    %c6_i32_96 = arith.constant 6 : i32
    %215 = arith.index_cast %c6_i32_96 : i32 to index
    %c0_97 = arith.constant 0 : index
    %216 = vector.load %arg8[%215, %c0_97] : memref<8x128xf32, #tpu.memory_space<vmem>>, vector<1x128xf32>
    %217 = arith.truncf %212 : vector<1x32xf32> to vector<1x32xbf16>
    %cst_98 = arith.constant dense<0.000000e+00> : vector<1x128xf32>
    %218 = tpu.matmul %217, %80, %cst_98 {dimension_numbers = #tpu.dot_dimension_numbers<[1], [0], [0], [1], [0, 0, 1, 1], [], []>} : vector<1x32xbf16>, vector<32x128xbf16>, vector<1x128xf32> -> vector<1x128xf32>
    %219 = arith.addf %216, %218 : vector<1x128xf32>
    %220 = arith.mulf %219, %89 : vector<1x128xf32>
    %221 = math.tanh %220 : vector<1x128xf32>
    %222 = arith.mulf %89, %221 : vector<1x128xf32>
    %223 = arith.addf %222, %92 : vector<1x128xf32>
    %224 = vector.extract_strided_slice %223 {offsets = [0, 0], sizes = [1, 32], strides = [1, 1]} : vector<1x128xf32> to vector<1x32xf32>
    %225 = vector.extract_strided_slice %223 {offsets = [0, 32], sizes = [1, 32], strides = [1, 1]} : vector<1x128xf32> to vector<1x32xf32>
    %226 = vector.extract_strided_slice %223 {offsets = [0, 64], sizes = [1, 32], strides = [1, 1]} : vector<1x128xf32> to vector<1x32xf32>
    %227 = vector.extract_strided_slice %223 {offsets = [0, 96], sizes = [1, 32], strides = [1, 1]} : vector<1x128xf32> to vector<1x32xf32>
    %228 = arith.mulf %225, %210 : vector<1x32xf32>
    %229 = arith.mulf %224, %226 : vector<1x32xf32>
    %230 = arith.addf %228, %229 : vector<1x32xf32>
    %231 = math.tanh %230 : vector<1x32xf32>
    %232 = arith.mulf %227, %231 : vector<1x32xf32>
    %233 = arith.index_cast %c6_i32_96 : i32 to index
    %c0_99 = arith.constant 0 : index
    %234 = vector.load %arg6[%233, %c0_99] : memref<9x32xf32, #tpu.memory_space<vmem>>, vector<1x32xf32>
    tpu.vector_store %arg6[%233, %c0_99], %232 {strides = array<i32>} : memref<9x32xf32, #tpu.memory_space<vmem>>, vector<1x32xf32>,
    %c7_i32_100 = arith.constant 7 : i32
    %235 = arith.index_cast %c7_i32_100 : i32 to index
    %c0_101 = arith.constant 0 : index
    %236 = vector.load %arg8[%235, %c0_101] : memref<8x128xf32, #tpu.memory_space<vmem>>, vector<1x128xf32>
    %237 = arith.truncf %232 : vector<1x32xf32> to vector<1x32xbf16>
    %cst_102 = arith.constant dense<0.000000e+00> : vector<1x128xf32>
    %238 = tpu.matmul %237, %80, %cst_102 {dimension_numbers = #tpu.dot_dimension_numbers<[1], [0], [0], [1], [0, 0, 1, 1], [], []>} : vector<1x32xbf16>, vector<32x128xbf16>, vector<1x128xf32> -> vector<1x128xf32>
    %239 = arith.addf %236, %238 : vector<1x128xf32>
    %240 = arith.mulf %239, %89 : vector<1x128xf32>
    %241 = math.tanh %240 : vector<1x128xf32>
    %242 = arith.mulf %89, %241 : vector<1x128xf32>
    %243 = arith.addf %242, %92 : vector<1x128xf32>
    %244 = vector.extract_strided_slice %243 {offsets = [0, 0], sizes = [1, 32], strides = [1, 1]} : vector<1x128xf32> to vector<1x32xf32>
    %245 = vector.extract_strided_slice %243 {offsets = [0, 32], sizes = [1, 32], strides = [1, 1]} : vector<1x128xf32> to vector<1x32xf32>
    %246 = vector.extract_strided_slice %243 {offsets = [0, 64], sizes = [1, 32], strides = [1, 1]} : vector<1x128xf32> to vector<1x32xf32>
    %247 = vector.extract_strided_slice %243 {offsets = [0, 96], sizes = [1, 32], strides = [1, 1]} : vector<1x128xf32> to vector<1x32xf32>
    %248 = arith.mulf %245, %230 : vector<1x32xf32>
    %249 = arith.mulf %244, %246 : vector<1x32xf32>
    %250 = arith.addf %248, %249 : vector<1x32xf32>
    %251 = math.tanh %250 : vector<1x32xf32>
    %252 = arith.mulf %247, %251 : vector<1x32xf32>
    %253 = arith.index_cast %c7_i32_100 : i32 to index
    %c0_103 = arith.constant 0 : index
    %254 = vector.load %arg6[%253, %c0_103] : memref<9x32xf32, #tpu.memory_space<vmem>>, vector<1x32xf32>
    tpu.vector_store %arg6[%253, %c0_103], %252 {strides = array<i32>} : memref<9x32xf32, #tpu.memory_space<vmem>>, vector<1x32xf32>,
    %c8_i32 = arith.constant 8 : i32
    %c8 = arith.constant 8 : index
    %c0_104 = arith.constant 0 : index
    %255 = vector.load %arg6[%c8, %c0_104] : memref<9x32xf32, #tpu.memory_space<vmem>>, vector<1x32xf32>
    tpu.vector_store %arg6[%c8, %c0_104], %250 {strides = array<i32>} : memref<9x32xf32, #tpu.memory_space<vmem>>, vector<1x32xf32>,
    return
  }
  func.func @transform_1(%arg0: i32, %arg1: memref<8xi32, #tpu.memory_space<smem>>) -> (i32, i32) {
    %c0_i32 = arith.constant 0 : i32
    %c0_i32_0 = arith.constant 0 : i32
    %c0_i32_1 = arith.constant 0 : i32
    return %c0_i32, %c0_i32_0 : i32, i32
  }
  func.func @transform_2(%arg0: i32, %arg1: memref<8xi32, #tpu.memory_space<smem>>) -> (i32, i32) {
    %c0_i32 = arith.constant 0 : i32
    %c0_i32_0 = arith.constant 0 : i32
    %c0_i32_1 = arith.constant 0 : i32
    return %c0_i32, %c0_i32_0 : i32, i32
  }
  func.func @transform_3(%arg0: i32, %arg1: memref<8xi32, #tpu.memory_space<smem>>) -> (i32, i32) {
    %c0_i32 = arith.constant 0 : i32
    %c0_i32_0 = arith.constant 0 : i32
    %c0_i32_1 = arith.constant 0 : i32
    return %c0_i32, %c0_i32_0 : i32, i32
  }
  func.func @transform_4(%arg0: i32, %arg1: memref<8xi32, #tpu.memory_space<smem>>) -> (i32, i32) {
    %c0_i32 = arith.constant 0 : i32
    %c0_i32_0 = arith.constant 0 : i32
    %c0_i32_1 = arith.constant 0 : i32
    return %c0_i32, %c0_i32_0 : i32, i32
  }
}

</mosaic_0001>

<bundles_post_ra>
// kernel: tpu_custom_call.1
= control target key start
LH: loop header
LB: loop body
LE: loop exit
PB: predicated region body
PF: predicated region fallthrough
CT: control target
= control target key end

     0   :  { %s1438_s18 = smov [#allocation6]   ;;  %s1810_s0 = inlined_call_operand.hbm [shape: s32[8], index: 0, kind: input, shape index: {}]   ;;  %s1811_s1 = inlined_call_operand.hbm [shape: f32[16,32], index: 1, kind: input, shape index: {}]   ;;  %s1812_s2 = inlined_call_operand.hbm [shape: bf16[32,128], index: 2, kind: input, shape index: {}]   ;;  %s1813_s3 = inlined_call_operand.hbm [shape: bf16[32,128], index: 3, kind: input, shape index: {}]   ;;  %s1814_s4 = inlined_call_operand.vmem [shape: f32[1,128], index: 4, kind: input, shape index: {}]   ;;  %s1815_s5 = inlined_call_operand.hbm [shape: f32[9,32], index: 5, kind: output, shape index: {}]  }
   0x1   :  { %11 = dma.hbm_to_smem %s1810_s0, 16, %s1438_s18, [#allocation5] }
   0x2   :  { %1414 = dma.done.wait [#allocation5], 16 }
   0x3   :  { %1415 = vsyncadd [#allocation5], 4294967280 }
   0x4   :  { %13 = sfence }
   0x5   :  { %14 = vsyncpa [#allocation8], 0 }
   0x6   :  { %15 = vsyncpa [#allocation11], 0 }
   0x7   :  { %16 = vsyncpa [#allocation9], 0  ;;  %s1439_s21 = smov [#allocation7]  }
   0x8   :  { %s22_s22 = sshll.u32 %s1439_s21, 4  ;;  %s23_s22 = int_to_ptr.vmem [resolvable:$true] %s22_s22 }
   0x9   :  { %s1186_s23 = scalar_lea.vmem %s23_s22, 256  ;;  %p1191_p1 = scmp.lt.s32.totalorder %s23_s22, %s23_s22 }
   0xa   :  { %p1187_p0 = scmp.ne.s32.totalorder %s23_s22, %s1186_s23  ;;  %p1192_p2 = scmp.lt.s32.totalorder %s1186_s23, %s1186_s23 }
   0xc   :  { %p1193_p3 = por %p1192_p2, %p1191_p1 }
   0xe   :  { %p1194_p4 = pnand %p1193_p3, %p1187_p0 }
  0x10   :  { %1197 = shalt.err (!%p1194_p4)
}
  0x11   :  { %s1440_s24 = smov 64   ;;  %s1441_s25 = smov 4  }
  0x12   :  { %28 = dma.hbm_to_vmem [thread:$0]  %s1812_s2, 256, %s23_s22, [#allocation8], %s1440_s24, %s1440_s24, %s1441_s25  }
  0x13   :  { %s1442_s27 = smov [#allocation10]  }
  0x14   :  { %s34_s28 = sshll.u32 %s1442_s27, 4  ;;  %s35_s28 = int_to_ptr.vmem [resolvable:$true] %s34_s28 }
  0x15   :  { %s1206_s29 = scalar_lea.vmem %s35_s28, 256  ;;  %p1211_p6 = scmp.lt.s32.totalorder %s35_s28, %s35_s28 }
  0x16   :  { %p1207_p5 = scmp.ne.s32.totalorder %s35_s28, %s1206_s29  ;;  %p1212_p7 = scmp.lt.s32.totalorder %s1206_s29, %s1206_s29 }
  0x18   :  { %p1213_p8 = por %p1212_p7, %p1211_p6 }
  0x1a   :  { %p1214_p9 = pnand %p1213_p8, %p1207_p5 }
  0x1c   :  { %1217 = shalt.err (!%p1214_p9)
}
  0x1d   :  { %40 = dma.hbm_to_vmem [thread:$0]  %s1813_s3, 256, %s35_s28, [#allocation11], %s1440_s24, %s1440_s24, %s1441_s25  }
  0x1e   :  { %1416 = dma.done.wait [#allocation8], 256  }
  0x1f   :  { %1417 = vsyncadd [#allocation8], 4294967040 }
  0x20   :  { %1418 = dma.done.wait [#allocation11], 256  }
  0x21   :  { %1419 = vsyncadd [#allocation11], 4294967040  ;;  %s50_s2 = sld [smem:[#allocation6]]  ;;  %s1443_s7 = smov [#allocation2]  }
  0x22   :  { %s60_s8 = sshll.u32 %s1443_s7, 4  ;;  %s1505_s9 = sld [smem:[#allocation6 + $0x1]]  ;;  %s1503_s8 = int_to_ptr.vmem [resolvable:$true] %s60_s8 }
  0x23   :  { %s1444_s10 = smov [#allocation2 + $0x1]   ;;  %s1507_s12 = sld [smem:[#allocation6 + $0x2]] }
  0x24   :  { %s76_s11 = sshll.u32 %s1444_s10, 4  ;;  %s1445_s13 = smov [#allocation2 + $0x2]   ;;  %s1509_s11 = int_to_ptr.vmem [resolvable:$true] %s76_s11 }
  0x25   :  { %s92_s3 = sshll.u32 %s1445_s13, 4  ;;  %s1511_s14 = sld [smem:[#allocation6 + $0x3]]  ;;  %s1513_s3 = int_to_ptr.vmem [resolvable:$true] %s92_s3 }
  0x26   :  { %s1446_s16 = smov [#allocation2 + $0x3]   ;;  %s1524_s0 = scalar_lea.hbm %s1811_s1, 256 }
  0x27   :  { %s977_s15 = sshll.u32 %s50_s2, 4  ;;  %s1515_s17 = sshll.u32 %s1446_s16, 4  ;;  %s109_s17 = int_to_ptr.vmem [resolvable:$true] %s1515_s17 }
  0x28   :  { %s52_s20 = scalar_lea.hbm %s1811_s1, %s977_s15  ;;  %s979_s21 = sshll.u32 %s1505_s9, 4 }
  0x29   :  { %s1218_s22 = scalar_lea.hbm %s52_s20, 16  ;;  %p1221_p11 = scmp.lt.s32.totalorder %s52_s20, %s1811_s1 }
  0x2a   :  { %p1219_p10 = scmp.ne.s32.totalorder %s52_s20, %s1218_s22  ;;  %p1222_p12 = scmp.lt.s32.totalorder %s1524_s0, %s1218_s22 }
  0x2c   :  { %p1223_p13 = por %p1222_p12, %p1221_p11 }
  0x2e   :  { %p1224_p0 = pnand %p1223_p13, %p1219_p10 }
  0x30   :  { %1227 = shalt.err (!%p1224_p0)  }
  0x31   :  { %s1228_s28 = scalar_lea.vmem %s1503_s8, 16  ;;  %s1533_s29 = scalar_lea.vmem %s1503_s8, 128 }
  0x32   :  { %p1229_p1 = scmp.ne.s32.totalorder %s1503_s8, %s1228_s28  ;;  %p1233_p2 = scmp.lt.s32.totalorder %s1503_s8, %s1503_s8 }
  0x33   :  { %p1234_p3 = scmp.lt.s32.totalorder %s1533_s29, %s1228_s28 }
  0x35   :  { %p1235_p4 = por %p1234_p3, %p1233_p2 }
  0x37   :  { %p1236_p5 = pnand %p1235_p4, %p1229_p1 }
  0x39   :  { %1239 = shalt.err (!%p1236_p5)  }
  0x3a   :  { %63 = dma.hbm_to_vmem [thread:$0]  %s52_s20, 16, %s1503_s8, [#allocation4] }
  0x3b   :  { %s66_s2 = scalar_lea.hbm %s1811_s1, %s979_s21  ;;  %s981_s7 = sshll.u32 %s1507_s12, 4 }
  0x3c   :  { %s1240_s9 = scalar_lea.hbm %s66_s2, 16  ;;  %p1243_p7 = scmp.lt.s32.totalorder %s66_s2, %s1811_s1 }
  0x3d   :  { %p1241_p6 = scmp.ne.s32.totalorder %s66_s2, %s1240_s9  ;;  %p1244_p8 = scmp.lt.s32.totalorder %s1524_s0, %s1240_s9 }
  0x3f   :  { %p1245_p9 = por %p1244_p8, %p1243_p7 }
  0x41   :  { %p1246_p10 = pnand %p1245_p9, %p1241_p6 }
  0x43   :  { %1249 = shalt.err (!%p1246_p10)  }
  0x44   :  { %s1250_s15 = scalar_lea.vmem %s1509_s11, 16  ;;  %p1255_p12 = scmp.lt.s32.totalorder %s1509_s11, %s1503_s8 }
  0x45   :  { %p1251_p11 = scmp.ne.s32.totalorder %s1509_s11, %s1250_s15  ;;  %p1256_p13 = scmp.lt.s32.totalorder %s1533_s29, %s1250_s15 }
  0x47   :  { %p1257_p0 = por %p1256_p13, %p1255_p12 }
  0x49   :  { %p1258_p1 = pnand %p1257_p0, %p1251_p11 }
  0x4b   :  { %1261 = shalt.err (!%p1258_p1)  }
  0x4c   :  { %79 = dma.hbm_to_vmem [thread:$0]  %s66_s2, 16, %s1509_s11, [#allocation4 + $0x1] }
  0x4d   :  { %s82_s18 = scalar_lea.hbm %s1811_s1, %s981_s7  ;;  %s983_s19 = sshll.u32 %s1511_s14, 4 }
  0x4e   :  { %s1262_s20 = scalar_lea.hbm %s82_s18, 16  ;;  %p1265_p3 = scmp.lt.s32.totalorder %s82_s18, %s1811_s1 }
  0x4f   :  { %p1263_p2 = scmp.ne.s32.totalorder %s82_s18, %s1262_s20  ;;  %p1266_p4 = scmp.lt.s32.totalorder %s1524_s0, %s1262_s20 }
  0x51   :  { %p1267_p5 = por %p1266_p4, %p1265_p3 }
  0x53   :  { %p1268_p6 = pnand %p1267_p5, %p1263_p2 }
  0x55   :  { %1271 = shalt.err (!%p1268_p6)  }
  0x56   :  { %s1272_s11 = scalar_lea.vmem %s1513_s3, 16  ;;  %p1277_p8 = scmp.lt.s32.totalorder %s1513_s3, %s1503_s8 }
  0x57   :  { %p1273_p7 = scmp.ne.s32.totalorder %s1513_s3, %s1272_s11  ;;  %p1278_p9 = scmp.lt.s32.totalorder %s1533_s29, %s1272_s11 }
  0x59   :  { %p1279_p10 = por %p1278_p9, %p1277_p8 }
  0x5b   :  { %p1280_p11 = pnand %p1279_p10, %p1273_p7 }
  0x5d   :  { %1283 = shalt.err (!%p1280_p11)  }
  0x5e   :  { %95 = dma.hbm_to_vmem [thread:$0]  %s82_s18, 16, %s1513_s3, [#allocation4 + $0x2] }
  0x5f   :  { %s98_s25 = scalar_lea.hbm %s1811_s1, %s983_s19 }
  0x60   :  { %s1284_s26 = scalar_lea.hbm %s98_s25, 16  ;;  %p1287_p13 = scmp.lt.s32.totalorder %s98_s25, %s1811_s1 }
  0x61   :  { %p1285_p12 = scmp.ne.s32.totalorder %s98_s25, %s1284_s26  ;;  %p1288_p0 = scmp.lt.s32.totalorder %s1524_s0, %s1284_s26 }
  0x63   :  { %p1289_p1 = por %p1288_p0, %p1287_p13 }
  0x65   :  { %p1290_p2 = pnand %p1289_p1, %p1285_p12 }
  0x67   :  { %1293 = shalt.err (!%p1290_p2)  }
  0x68   :  { %s1294_s30 = scalar_lea.vmem %s109_s17, 16  ;;  %p1299_p4 = scmp.lt.s32.totalorder %s109_s17, %s1503_s8 }
  0x69   :  { %p1295_p3 = scmp.ne.s32.totalorder %s109_s17, %s1294_s30  ;;  %p1300_p5 = scmp.lt.s32.totalorder %s1533_s29, %s1294_s30 }
  0x6b   :  { %p1301_p6 = por %p1300_p5, %p1299_p4 }
  0x6d   :  { %p1302_p7 = pnand %p1301_p6, %p1295_p3 }
  0x6f   :  { %1305 = shalt.err (!%p1302_p7)  }
  0x70   :  { %111 = dma.hbm_to_vmem [thread:$0]  %s98_s25, 16, %s109_s17, [#allocation4 + $0x3] }
  0x71   :  { %s984_s3 = sld [smem:[#allocation6 + $0x4]]  ;;  %s1447_s6 = smov [#allocation2 + $0x4]  }
  0x72   :  { %s124_s2 = sshll.u32 %s1447_s6, 4  ;;  %s1577_s7 = sld [smem:[#allocation6 + $0x5]]  ;;  %s125_s2 = int_to_ptr.vmem [resolvable:$true] %s124_s2 }
  0x73   :  { %s1448_s9 = smov [#allocation2 + $0x5]   ;;  %s1579_s13 = sld [smem:[#allocation6 + $0x6]] }
  0x74   :  { %s140_s10 = sshll.u32 %s1448_s9, 4  ;;  %s1449_s15 = smov [#allocation2 + $0x6]   ;;  %s1581_s10 = int_to_ptr.vmem [resolvable:$true] %s140_s10 }
  0x75   :  { %s156_s12 = sshll.u32 %s1449_s15, 4  ;;  %s1583_s16 = sld [smem:[#allocation6 + $0x7]]  ;;  %s1585_s12 = int_to_ptr.vmem [resolvable:$true] %s156_s12 }
  0x77   :  { %s985_s18 = sshll.u32 %s984_s3, 4 }
  0x78   :  { %s114_s20 = scalar_lea.hbm %s1811_s1, %s985_s18  ;;  %s987_s21 = sshll.u32 %s1577_s7, 4 }
  0x79   :  { %s1306_s22 = scalar_lea.hbm %s114_s20, 16  ;;  %p1309_p9 = scmp.lt.s32.totalorder %s114_s20, %s1811_s1 }
  0x7a   :  { %p1307_p8 = scmp.ne.s32.totalorder %s114_s20, %s1306_s22  ;;  %p1310_p10 = scmp.lt.s32.totalorder %s1524_s0, %s1306_s22 }
  0x7c   :  { %p1311_p11 = por %p1310_p10, %p1309_p9 }
  0x7e   :  { %p1312_p12 = pnand %p1311_p11, %p1307_p8 }
  0x80   :  { %1315 = shalt.err (!%p1312_p12)  }
  0x81   :  { %s1316_s23 = scalar_lea.vmem %s125_s2, 16  ;;  %p1321_p0 = scmp.lt.s32.totalorder %s125_s2, %s1503_s8 }
  0x82   :  { %p1317_p13 = scmp.ne.s32.totalorder %s125_s2, %s1316_s23  ;;  %p1322_p1 = scmp.lt.s32.totalorder %s1533_s29, %s1316_s23 }
  0x84   :  { %p1323_p2 = por %p1322_p1, %p1321_p0 }
  0x86   :  { %p1324_p3 = pnand %p1323_p2, %p1317_p13 }
  0x88   :  { %1327 = shalt.err (!%p1324_p3)  }
  0x89   :  { %127 = dma.hbm_to_vmem [thread:$0]  %s114_s20, 16, %s125_s2, [#allocation4 + $0x4] }
  0x8a   :  { %s130_s27 = scalar_lea.hbm %s1811_s1, %s987_s21  ;;  %s989_s28 = sshll.u32 %s1579_s13, 4 }
  0x8b   :  { %s1328_s30 = scalar_lea.hbm %s130_s27, 16  ;;  %p1331_p5 = scmp.lt.s32.totalorder %s130_s27, %s1811_s1 }
  0x8c   :  { %p1329_p4 = scmp.ne.s32.totalorder %s130_s27, %s1328_s30  ;;  %p1332_p6 = scmp.lt.s32.totalorder %s1524_s0, %s1328_s30 }
  0x8e   :  { %p1333_p7 = por %p1332_p6, %p1331_p5 }
  0x90   :  { %p1334_p8 = pnand %p1333_p7, %p1329_p4 }
  0x92   :  { %1337 = shalt.err (!%p1334_p8)  }
  0x93   :  { %s1338_s2 = scalar_lea.vmem %s1581_s10, 16  ;;  %p1343_p10 = scmp.lt.s32.totalorder %s1581_s10, %s1503_s8 }
  0x94   :  { %p1339_p9 = scmp.ne.s32.totalorder %s1581_s10, %s1338_s2  ;;  %p1344_p11 = scmp.lt.s32.totalorder %s1533_s29, %s1338_s2 }
  0x96   :  { %p1345_p12 = por %p1344_p11, %p1343_p10 }
  0x98   :  { %p1346_p13 = pnand %p1345_p12, %p1339_p9 }
  0x9a   :  { %1349 = shalt.err (!%p1346_p13)  }
  0x9b   :  { %143 = dma.hbm_to_vmem [thread:$0]  %s130_s27, 16, %s1581_s10, [#allocation4 + $0x5] }
  0x9c   :  { %s146_s13 = scalar_lea.hbm %s1811_s1, %s989_s28  ;;  %s991_s15 = sshll.u32 %s1583_s16, 4 }
  0x9d   :  { %s1350_s18 = scalar_lea.hbm %s146_s13, 16  ;;  %p1353_p1 = scmp.lt.s32.totalorder %s146_s13, %s1811_s1 }
  0x9e   :  { %p1351_p0 = scmp.ne.s32.totalorder %s146_s13, %s1350_s18  ;;  %p1354_p2 = scmp.lt.s32.totalorder %s1524_s0, %s1350_s18 }
  0xa0   :  { %p1355_p3 = por %p1354_p2, %p1353_p1 }
  0xa2   :  { %p1356_p4 = pnand %p1355_p3, %p1351_p0 }
  0xa4   :  { %1359 = shalt.err (!%p1356_p4)  }
  0xa5   :  { %s1360_s10 = scalar_lea.vmem %s1585_s12, 16  ;;  %p1365_p6 = scmp.lt.s32.totalorder %s1585_s12, %s1503_s8 }
  0xa6   :  { %p1361_p5 = scmp.ne.s32.totalorder %s1585_s12, %s1360_s10  ;;  %p1366_p7 = scmp.lt.s32.totalorder %s1533_s29, %s1360_s10 }
  0xa8   :  { %p1367_p8 = por %p1366_p7, %p1365_p6 }
  0xaa   :  { %p1368_p9 = pnand %p1367_p8, %p1361_p5 }
  0xac   :  { %1371 = shalt.err (!%p1368_p9)  }
  0xad   :  { %159 = dma.hbm_to_vmem [thread:$0]  %s146_s13, 16, %s1585_s12, [#allocation4 + $0x6] }
  0xae   :  { %s162_s21 = scalar_lea.hbm %s1811_s1, %s991_s15  ;;  %s1450_s22 = smov [#allocation2 + $0x7]  }
  0xaf   :  { %s172_s11 = sshll.u32 %s1450_s22, 4  ;;  %s1372_s14 = scalar_lea.hbm %s162_s21, 16  ;;  %s173_s11 = int_to_ptr.vmem [resolvable:$true] %s172_s11 }
  0xb0   :  { %p1373_p10 = scmp.ne.s32.totalorder %s162_s21, %s1372_s14  ;;  %p1375_p11 = scmp.lt.s32.totalorder %s162_s21, %s1811_s1 }
  0xb1   :  { %p1376_p12 = scmp.lt.s32.totalorder %s1524_s0, %s1372_s14 }
  0xb3   :  { %p1377_p13 = por %p1376_p12, %p1375_p11 }
  0xb5   :  { %p1378_p0 = pnand %p1377_p13, %p1373_p10 }
  0xb7   :  { %1381 = shalt.err (!%p1378_p0)  }
  0xb8   :  { %s1382_s26 = scalar_lea.vmem %s173_s11, 16  ;;  %p1387_p2 = scmp.lt.s32.totalorder %s173_s11, %s1503_s8 }
  0xb9   :  { %p1383_p1 = scmp.ne.s32.totalorder %s173_s11, %s1382_s26  ;;  %p1388_p3 = scmp.lt.s32.totalorder %s1533_s29, %s1382_s26 }
  0xbb   :  { %p1389_p4 = por %p1388_p3, %p1387_p2 }
  0xbd   :  { %p1390_p5 = pnand %p1389_p4, %p1383_p1 }
  0xbf   :  { %1393 = shalt.err (!%p1390_p5)  }
  0xc0   :  { %175 = dma.hbm_to_vmem [thread:$0]  %s162_s21, 16, %s173_s11, [#allocation4 + $0x7] }
  0xc1   :  { %1420 = dma.done.wait [#allocation4], 16 }
  0xc2   :  { %1421 = vsyncadd [#allocation4], 4294967280 }
  0xc3   :  { %1422 = dma.done.wait [#allocation4 + $0x1], 16 }
  0xc4   :  { %1423 = vsyncadd [#allocation4 + $0x1], 4294967280 }
  0xc5   :  { %1424 = dma.done.wait [#allocation4 + $0x2], 16 }
  0xc6   :  { %1425 = vsyncadd [#allocation4 + $0x2], 4294967280 }
  0xc7   :  { %1426 = dma.done.wait [#allocation4 + $0x3], 16 }
  0xc8   :  { %1427 = vsyncadd [#allocation4 + $0x3], 4294967280 }
  0xc9   :  { %1428 = dma.done.wait [#allocation4 + $0x4], 16 }
  0xca   :  { %1429 = vsyncadd [#allocation4 + $0x4], 4294967280 }
  0xcb   :  { %1430 = dma.done.wait [#allocation4 + $0x5], 16 }
  0xcc   :  { %1431 = vsyncadd [#allocation4 + $0x5], 4294967280 }
  0xcd   :  { %1432 = dma.done.wait [#allocation4 + $0x6], 16 }
  0xce   :  { %1433 = vsyncadd [#allocation4 + $0x6], 4294967280 }
  0xcf   :  { %1434 = dma.done.wait [#allocation4 + $0x7], 16 }
  0xd0   :  { %1435 = vsyncadd [#allocation4 + $0x7], 4294967280  ;;  %v1451_v0 = vmov 0.0   ;;  %vm1452_vm0 = vmmov 0   ;;  %v1134_v1 = vld [vmem:[#allocation7 + $0x8] sm:$0xff]   ;;  %v1135_v2 = vld [vmem:[#allocation7] sm:$0xff]   ;;  %v267_v8 = vlaneseq }
  0xd1   :  { %1040 = vmatprep.subr.bf16.mxu0 %v1451_v0  ;;  %1048 = vmatprep.subr.bf16.mxu1 %v1451_v0  ;;  %v1640_v3 = vld [vmem:[#allocation10 + $0x8] sm:$0xff]   ;;  %v193_v4 = vld [vmem:[#allocation2] sm:$0xff]  ;;  %vm218_vm1 = vcmask 261120   ;;  %v1453_v7 = vmov 0   ;;  %v1454_v20 = vmov 0.5   ;;  %vm356_vm5 = vcmask 253952  }
  0xd2   :  { %1044 = vmatprep.mubr.msk.bf16.mxu0 %vm1452_vm0, %v1451_v0  ;;  %1052 = vmatprep.mubr.msk.bf16.mxu1 %vm1452_vm0, %v1451_v0  ;;  %v1644_v5 = vld [vmem:[#allocation10] sm:$0xff]   ;;  %v194_v6 = vpack.c.bf16 %v193_v4, %v193_v4  ;;  %v268_v11 = vand.u32 127, %v267_v8  ;;  %s1456_s0 = smov 96  }
  0xd3   :  { %1041 = vmatpush3.bf16.msra.mxu0 %v1134_v1  ;;  %1049 = vmatpush3.bf16.msra.mxu1 %v1640_v3  ;;  %v992_v9 = vld [vmem:[%s1814_s4] ss:$0 sm:$0xff]  ;;  %s1455_s4 = smov 32  }
  0xd4   :  { %1042 = vmatprep.subr.bf16.mxu0 %v1451_v0  ;;  %1050 = vmatprep.subr.bf16.mxu1 %v1451_v0  ;;  %vm269_vm2 = vcmp.ge.s32.totalorder %v268_v11, 64  ;;  %vm270_vm3 = vcmp.lt.s32.totalorder %v268_v11, 96 }
  0xd5   :  { %vm271_vm4 = vmand %vm269_vm2, %vm270_vm3 }
  0xd6   :  { %v1666_v21 = vsel %vm271_vm4, 1.0, %v1454_v20  ;;  %v1669_v26 = vsel %vm271_vm4, 0.0, %v1454_v20 }
  0xd7   :  { %1043 = vmatpush3.bf16.msra.mxu0 %v1135_v2  ;;  %1051 = vmatpush3.bf16.msra.mxu1 %v1644_v5 }
  0xd8   :  { %1056 = vmatprep.subr.bf16.mxu0 %v1451_v0  ;;  %1064 = vmatprep.subr.bf16.mxu1 %v1451_v0 }
  0xda   :  { %1045 = vmatmul.mubr.msk.bf16.vlgmr.msra.gmra.mxu0 %vm218_vm1, %v194_v6  ;;  %1053 = vmatmul.mubr.bf16.vlgmr.msra.gmra.mxu1 %v1453_v7 }
  0xdb   :  { %1057 = vmatpush3.bf16.msra.mxu0 %v1640_v3  ;;  %1060 = vmatprep.mubr.msk.bf16.mxu0 %vm1452_vm0, %v1451_v0 }
  0xdc   :  { %1058 = vmatprep.subr.bf16.mxu0 %v1451_v0  ;;  %1065 = vmatpush3.bf16.msra.mxu1 %v1640_v3 }
  0xdd   :  { %1068 = vmatprep.mubr.msk.bf16.mxu1 %vm1452_vm0, %v1451_v0  ;;  %1066 = vmatprep.subr.bf16.mxu1 %v1451_v0 }
  0xdf   :  { %1059 = vmatpush3.bf16.msra.mxu0 %v1644_v5 }
  0xe0   :  { %1072 = vmatprep.subr.bf16.mxu0 %v1451_v0  ;;  %1067 = vmatpush3.bf16.msra.mxu1 %v1644_v5 }
  0xe1   :  { %1080 = vmatprep.subr.bf16.mxu1 %v1451_v0 }
 0x19a   :  { %v256_v10 = vpop.f32.mrf.mxu0  ;;  %v324_v14 = vpop.f32.mrf.mxu1 }
 0x19b   :  { %v257_v12 = vadd.f32 %v992_v9, %v256_v10 }
 0x19c   :  { %v1046_v13 = vpop.f32.mrf.mxu0  ;;  %v1054_v16 = vpop.f32.mrf.mxu1 }
 0x19d   :  { %262 = vst [vmem:[#allocation3] sm:$0xff] %v257_v12 }
 0x19e   :  { %v259_v15 = vpop.f32.mrf.mxu0  ;;  %v327_v18 = vpop.f32.mrf.mxu1 }
 0x1a0   :  { %v1047_v17 = vpop.f32.mrf.mxu0  ;;  %v1055_v19 = vpop.f32.mrf.mxu1 }
 0x1a4   :  { %v274_v22 = vld [vmem:[#allocation3] sm:$0x1]  ;;  %v358_v39 = vld [vmem:[#allocation3 + $0x1] sm:$0x1]  ;;  %v433_v59 = vld [vmem:[#allocation3 + $0x2] sm:$0x1] }
 0x1a5   :  { %v330_v23 = vadd.f32 %v324_v14, %v274_v22  ;;  %v508_v18 = vld [vmem:[#allocation3 + $0x3] sm:$0x1] }
 0x1a7   :  { %v331_v24 = vmul.f32 %v330_v23, %v1666_v21 }
 0x1a9   :  { %1138 = vtanh.f32 %v331_v24 }
 0x1b6   :  { %v1139_v25 = vpop.eup %1138 }
 0x1b7   :  { %v333_v27 = vmul.f32 %v1139_v25, %v1666_v21 }
 0x1b9   :  { %v334_v28 = vadd.f32 %v333_v27, %v1669_v26 }
 0x1bb   :  { %337 = vrot.lane.b32.xlu0 %v334_v28, %s1440_s24  ;;  %v335_v31 = vmul.f32 0.0, %v334_v28 }
 0x22d   :  { %v338_v29 = vpop.permute.xlu0 %337 }
 0x22e   :  { %v340_v30 = vmul.f32 %v338_v29, %v334_v28 }
 0x230   :  { %342 = vrot.lane.b32.xlu0 %v340_v30, %s1455_s4 }
 0x2a2   :  { %v343_v32 = vpop.permute.xlu0 %342 }
 0x2a3   :  { %v345_v33 = vadd.f32 %v343_v32, %v335_v31 }
 0x2a5   :  { %1140 = vtanh.f32 %v345_v33 }
 0x2b2   :  { %v1141_v34 = vpop.eup %1140 }
 0x2b3   :  { %348 = vrot.lane.b32.xlu1 %v1141_v34, %s1440_s24 }
 0x325   :  { %v349_v35 = vpop.permute.xlu1 %348 }
 0x326   :  { %v1676_v36 = vmul.f32 %v349_v35, %v334_v28 }
 0x328   :  { %v359_v37 = vpack.c.bf16 %v1676_v36, %v1676_v36 }
 0x32a   :  { %361 = vrot.lane.b32.xlu1 %v359_v37, %s1455_s4 }
 0x39c   :  { %v362_v38 = vpop.permute.xlu1 %361 }
 0x39d   :  { %1061 = vmatmul.mubr.msk.bf16.vlgmr.msra.gmra.mxu0 %vm218_vm1, %v362_v38 }
 0x39e   :  { %1073 = vmatpush3.bf16.msra.mxu0 %v1640_v3  ;;  %1076 = vmatprep.mubr.msk.bf16.mxu0 %vm1452_vm0, %v1451_v0 }
 0x39f   :  { %1074 = vmatprep.subr.bf16.mxu0 %v1451_v0 }
 0x3a2   :  { %1075 = vmatpush3.bf16.msra.mxu0 %v1644_v5 }
 0x3a3   :  { %1088 = vmatprep.subr.bf16.mxu0 %v1451_v0 }
 0x45d   :  { %v400_v40 = vpop.f32.mrf.mxu0 }
 0x45e   :  { %v406_v41 = vadd.f32 %v400_v40, %v358_v39 }
 0x45f   :  { %v1062_v42 = vpop.f32.mrf.mxu0 }
 0x460   :  { %v407_v43 = vmul.f32 %v406_v41, %v1666_v21  ;;  %v583_v41 = vld [vmem:[#allocation3 + $0x4] sm:$0x1] }
 0x461   :  { %v403_v44 = vpop.f32.mrf.mxu0 }
 0x462   :  { %1142 = vtanh.f32 %v407_v43 }
 0x463   :  { %v1063_v45 = vpop.f32.mrf.mxu0 }
 0x46f   :  { %v1143_v46 = vpop.eup %1142 }
 0x470   :  { %v409_v47 = vmul.f32 %v1143_v46, %v1666_v21 }
 0x472   :  { %v410_v48 = vadd.f32 %v409_v47, %v1669_v26 }
 0x474   :  { %413 = vrot.lane.b32.xlu0 %v410_v48, %s1440_s24  ;;  %v411_v51 = vmul.f32 %v410_v48, %v345_v33 }
 0x4e6   :  { %v414_v49 = vpop.permute.xlu0 %413 }
 0x4e7   :  { %v416_v50 = vmul.f32 %v414_v49, %v410_v48 }
 0x4e9   :  { %418 = vrot.lane.b32.xlu1 %v416_v50, %s1455_s4 }
 0x55b   :  { %v419_v52 = vpop.permute.xlu1 %418 }
 0x55c   :  { %v421_v53 = vadd.f32 %v419_v52, %v411_v51 }
 0x55e   :  { %1144 = vtanh.f32 %v421_v53 }
 0x56b   :  { %v1145_v54 = vpop.eup %1144 }
 0x56c   :  { %424 = vrot.lane.b32.xlu0 %v1145_v54, %s1440_s24 }
 0x5de   :  { %v425_v55 = vpop.permute.xlu0 %424 }
 0x5df   :  { %v1694_v56 = vmul.f32 %v425_v55, %v410_v48 }
 0x5e1   :  { %v434_v57 = vpack.c.bf16 %v1694_v56, %v1694_v56 }
 0x5e3   :  { %436 = vrot.lane.b32.xlu1 %v434_v57, %s1455_s4 }
 0x655   :  { %v437_v58 = vpop.permute.xlu1 %436 }
 0x656   :  { %1069 = vmatmul.mubr.msk.bf16.vlgmr.msra.gmra.mxu1 %vm218_vm1, %v437_v58 }
 0x657   :  { %1081 = vmatpush3.bf16.msra.mxu1 %v1640_v3  ;;  %1084 = vmatprep.mubr.msk.bf16.mxu1 %vm1452_vm0, %v1451_v0 }
 0x658   :  { %1082 = vmatprep.subr.bf16.mxu1 %v1451_v0 }
 0x65b   :  { %1083 = vmatpush3.bf16.msra.mxu1 %v1644_v5 }
 0x65c   :  { %1096 = vmatprep.subr.bf16.mxu1 %v1451_v0 }
 0x716   :  { %v475_v60 = vpop.f32.mrf.mxu1 }
 0x717   :  { %v481_v61 = vadd.f32 %v475_v60, %v433_v59 }
 0x718   :  { %v1070_v62 = vpop.f32.mrf.mxu1 }
 0x719   :  { %v482_v63 = vmul.f32 %v481_v61, %v1666_v21  ;;  %v658_v62 = vld [vmem:[#allocation3 + $0x5] sm:$0x1] }
 0x71a   :  { %v478_v1 = vpop.f32.mrf.mxu1 }
 0x71b   :  { %1146 = vtanh.f32 %v482_v63 }
 0x71c   :  { %v1071_v2 = vpop.f32.mrf.mxu1 }
 0x728   :  { %v1147_v4 = vpop.eup %1146 }
 0x729   :  { %v484_v6 = vmul.f32 %v1147_v4, %v1666_v21 }
 0x72b   :  { %v485_v7 = vadd.f32 %v484_v6, %v1669_v26 }
 0x72d   :  { %488 = vrot.lane.b32.xlu0 %v485_v7, %s1440_s24  ;;  %v486_v10 = vmul.f32 %v485_v7, %v421_v53 }
 0x79f   :  { %v489_v8 = vpop.permute.xlu0 %488 }
 0x7a0   :  { %v491_v9 = vmul.f32 %v489_v8, %v485_v7 }
 0x7a2   :  { %493 = vrot.lane.b32.xlu1 %v491_v9, %s1455_s4 }
 0x814   :  { %v494_v11 = vpop.permute.xlu1 %493 }
 0x815   :  { %v496_v12 = vadd.f32 %v494_v11, %v486_v10 }
 0x817   :  { %1148 = vtanh.f32 %v496_v12 }
 0x824   :  { %v1149_v13 = vpop.eup %1148 }
 0x825   :  { %499 = vrot.lane.b32.xlu0 %v1149_v13, %s1440_s24 }
 0x897   :  { %v500_v14 = vpop.permute.xlu0 %499 }
 0x898   :  { %v1712_v15 = vmul.f32 %v500_v14, %v485_v7 }
 0x89a   :  { %v509_v16 = vpack.c.bf16 %v1712_v15, %v1712_v15 }
 0x89c   :  { %511 = vrot.lane.b32.xlu1 %v509_v16, %s1455_s4 }
 0x90e   :  { %v512_v17 = vpop.permute.xlu1 %511 }
 0x90f   :  { %1077 = vmatmul.mubr.msk.bf16.vlgmr.msra.gmra.mxu0 %vm218_vm1, %v512_v17 }
 0x910   :  { %1089 = vmatpush3.bf16.msra.mxu0 %v1640_v3  ;;  %1092 = vmatprep.mubr.msk.bf16.mxu0 %vm1452_vm0, %v1451_v0 }
 0x911   :  { %1090 = vmatprep.subr.bf16.mxu0 %v1451_v0 }
 0x914   :  { %1091 = vmatpush3.bf16.msra.mxu0 %v1644_v5 }
 0x915   :  { %1104 = vmatprep.subr.bf16.mxu0 %v1451_v0 }
 0x9cf   :  { %v550_v19 = vpop.f32.mrf.mxu0 }
 0x9d0   :  { %v556_v20 = vadd.f32 %v550_v19, %v508_v18  ;;  %v733_v19 = vld [vmem:[#allocation3 + $0x6] sm:$0x1] }
 0x9d1   :  { %v1078_v22 = vpop.f32.mrf.mxu0 }
 0x9d2   :  { %v557_v23 = vmul.f32 %v556_v20, %v1666_v21 }
 0x9d3   :  { %v553_v24 = vpop.f32.mrf.mxu0 }
 0x9d4   :  { %1150 = vtanh.f32 %v557_v23 }
 0x9d5   :  { %v1079_v25 = vpop.f32.mrf.mxu0 }
 0x9e1   :  { %v1151_v27 = vpop.eup %1150 }
 0x9e2   :  { %v559_v28 = vmul.f32 %v1151_v27, %v1666_v21 }
 0x9e4   :  { %v560_v29 = vadd.f32 %v559_v28, %v1669_v26 }
 0x9e6   :  { %563 = vrot.lane.b32.xlu0 %v560_v29, %s1440_s24  ;;  %v561_v32 = vmul.f32 %v560_v29, %v496_v12 }
 0xa58   :  { %v564_v30 = vpop.permute.xlu0 %563 }
 0xa59   :  { %v566_v31 = vmul.f32 %v564_v30, %v560_v29 }
 0xa5b   :  { %568 = vrot.lane.b32.xlu1 %v566_v31, %s1455_s4 }
 0xacd   :  { %v569_v33 = vpop.permute.xlu1 %568 }
 0xace   :  { %v571_v34 = vadd.f32 %v569_v33, %v561_v32 }
 0xad0   :  { %1152 = vtanh.f32 %v571_v34 }
 0xadd   :  { %v1153_v35 = vpop.eup %1152 }
 0xade   :  { %574 = vrot.lane.b32.xlu0 %v1153_v35, %s1440_s24 }
 0xb50   :  { %v575_v37 = vpop.permute.xlu0 %574 }
 0xb51   :  { %v1730_v38 = vmul.f32 %v575_v37, %v560_v29 }
 0xb53   :  { %v584_v39 = vpack.c.bf16 %v1730_v38, %v1730_v38 }
 0xb55   :  { %586 = vrot.lane.b32.xlu1 %v584_v39, %s1455_s4 }
 0xbc7   :  { %v587_v40 = vpop.permute.xlu1 %586 }
 0xbc8   :  { %1085 = vmatmul.mubr.msk.bf16.vlgmr.msra.gmra.mxu1 %vm218_vm1, %v587_v40 }
 0xbc9   :  { %1097 = vmatpush3.bf16.msra.mxu1 %v1640_v3  ;;  %1100 = vmatprep.mubr.msk.bf16.mxu1 %vm1452_vm0, %v1451_v0 }
 0xbca   :  { %1098 = vmatprep.subr.bf16.mxu1 %v1451_v0 }
 0xbcd   :  { %1099 = vmatpush3.bf16.msra.mxu1 %v1644_v5 }
 0xc88   :  { %v625_v42 = vpop.f32.mrf.mxu1 }
 0xc89   :  { %v631_v43 = vadd.f32 %v625_v42, %v583_v41 }
 0xc8a   :  { %v1086_v44 = vpop.f32.mrf.mxu1 }
 0xc8b   :  { %v632_v45 = vmul.f32 %v631_v43, %v1666_v21  ;;  %v808_v43 = vld [vmem:[#allocation3 + $0x7] sm:$0x1] }
 0xc8c   :  { %v628_v46 = vpop.f32.mrf.mxu1 }
 0xc8d   :  { %1154 = vtanh.f32 %v632_v45 }
 0xc8e   :  { %v1087_v47 = vpop.f32.mrf.mxu1 }
 0xc9a   :  { %v1155_v48 = vpop.eup %1154 }
 0xc9b   :  { %v634_v49 = vmul.f32 %v1155_v48, %v1666_v21 }
 0xc9d   :  { %v635_v50 = vadd.f32 %v634_v49, %v1669_v26 }
 0xc9f   :  { %638 = vrot.lane.b32.xlu0 %v635_v50, %s1440_s24  ;;  %v636_v53 = vmul.f32 %v635_v50, %v571_v34 }
 0xd11   :  { %v639_v51 = vpop.permute.xlu0 %638 }
 0xd12   :  { %v641_v52 = vmul.f32 %v639_v51, %v635_v50 }
 0xd14   :  { %643 = vrot.lane.b32.xlu1 %v641_v52, %s1455_s4 }
 0xd86   :  { %v644_v54 = vpop.permute.xlu1 %643 }
 0xd87   :  { %v646_v55 = vadd.f32 %v644_v54, %v636_v53 }
 0xd89   :  { %1156 = vtanh.f32 %v646_v55 }
 0xd96   :  { %v1157_v57 = vpop.eup %1156 }
 0xd97   :  { %649 = vrot.lane.b32.xlu0 %v1157_v57, %s1440_s24 }
 0xe09   :  { %v650_v58 = vpop.permute.xlu0 %649 }
 0xe0a   :  { %v1747_v59 = vmul.f32 %v650_v58, %v635_v50 }
 0xe0c   :  { %v659_v60 = vpack.c.bf16 %v1747_v59, %v1747_v59 }
 0xe0e   :  { %661 = vrot.lane.b32.xlu1 %v659_v60, %s1455_s4 }
 0xe80   :  { %v662_v61 = vpop.permute.xlu1 %661 }
 0xe81   :  { %1093 = vmatmul.mubr.msk.bf16.vlgmr.msra.gmra.mxu0 %vm218_vm1, %v662_v61 }
 0xe82   :  { %1105 = vmatpush3.bf16.msra.mxu0 %v1640_v3  ;;  %1108 = vmatprep.mubr.msk.bf16.mxu0 %vm1452_vm0, %v1451_v0 }
 0xe83   :  { %1106 = vmatprep.subr.bf16.mxu0 %v1451_v0 }
 0xe86   :  { %1107 = vmatpush3.bf16.msra.mxu0 %v1644_v5 }
 0xf41   :  { %v700_v63 = vpop.f32.mrf.mxu0 }
 0xf42   :  { %v706_v1 = vadd.f32 %v700_v63, %v658_v62 }
 0xf43   :  { %v1094_v2 = vpop.f32.mrf.mxu0 }
 0xf44   :  { %v707_v4 = vmul.f32 %v706_v1, %v1666_v21 }
 0xf45   :  { %v703_v6 = vpop.f32.mrf.mxu0 }
 0xf46   :  { %1158 = vtanh.f32 %v707_v4 }
 0xf47   :  { %v1095_v7 = vpop.f32.mrf.mxu0 }
 0xf53   :  { %v1159_v8 = vpop.eup %1158 }
 0xf54   :  { %v709_v9 = vmul.f32 %v1159_v8, %v1666_v21 }
 0xf56   :  { %v710_v3 = vadd.f32 %v709_v9, %v1669_v26 }
 0xf58   :  { %713 = vrot.lane.b32.xlu0 %v710_v3, %s1440_s24  ;;  %v711_v5 = vmul.f32 %v710_v3, %v646_v55 }
 0xfca   :  { %v714_v10 = vpop.permute.xlu0 %713 }
 0xfcb   :  { %v716_v0 = vmul.f32 %v714_v10, %v710_v3 }
 0xfcd   :  { %718 = vrot.lane.b32.xlu1 %v716_v0, %s1455_s4 }
0x103f   :  { %v719_v11 = vpop.permute.xlu1 %718 }
0x1040   :  { %v721_v12 = vadd.f32 %v719_v11, %v711_v5 }
0x1042   :  { %1160 = vtanh.f32 %v721_v12 }
0x104f   :  { %v1161_v13 = vpop.eup %1160 }
0x1050   :  { %724 = vrot.lane.b32.xlu0 %v1161_v13, %s1440_s24 }
0x10c2   :  { %v725_v14 = vpop.permute.xlu0 %724 }
0x10c3   :  { %v1764_v16 = vmul.f32 %v725_v14, %v710_v3 }
0x10c5   :  { %v734_v17 = vpack.c.bf16 %v1764_v16, %v1764_v16 }
0x10c7   :  { %736 = vrot.lane.b32.xlu1 %v734_v17, %s1455_s4 }
0x1139   :  { %v737_v18 = vpop.permute.xlu1 %736 }
0x113a   :  { %1101 = vmatmul.mubr.msk.bf16.vlgmr.msra.gmra.mxu1 %vm218_vm1, %v737_v18 }
0x11fa   :  { %v775_v20 = vpop.f32.mrf.mxu1 }
0x11fb   :  { %v781_v22 = vadd.f32 %v775_v20, %v733_v19 }
0x11fc   :  { %v1102_v23 = vpop.f32.mrf.mxu1 }
0x11fd   :  { %v782_v24 = vmul.f32 %v781_v22, %v1666_v21 }
0x11fe   :  { %v778_v25 = vpop.f32.mrf.mxu1 }
0x11ff   :  { %1162 = vtanh.f32 %v782_v24 }
0x1200   :  { %v1103_v27 = vpop.f32.mrf.mxu1 }
0x120c   :  { %v1163_v28 = vpop.eup %1162 }
0x120d   :  { %v784_v29 = vmul.f32 %v1163_v28, %v1666_v21 }
0x120f   :  { %v785_v30 = vadd.f32 %v784_v29, %v1669_v26 }
0x1211   :  { %788 = vrot.lane.b32.xlu0 %v785_v30, %s1440_s24  ;;  %v786_v33 = vmul.f32 %v785_v30, %v721_v12 }
0x1283   :  { %v789_v31 = vpop.permute.xlu0 %788 }
0x1284   :  { %v791_v32 = vmul.f32 %v789_v31, %v785_v30 }
0x1286   :  { %793 = vrot.lane.b32.xlu1 %v791_v32, %s1455_s4 }
0x12f8   :  { %v794_v34 = vpop.permute.xlu1 %793 }
0x12f9   :  { %v796_v35 = vadd.f32 %v794_v34, %v786_v33 }
0x12fb   :  { %1164 = vtanh.f32 %v796_v35 }
0x1308   :  { %v1165_v37 = vpop.eup %1164 }
0x1309   :  { %799 = vrot.lane.b32.xlu0 %v1165_v37, %s1440_s24 }
0x137b   :  { %v800_v39 = vpop.permute.xlu0 %799 }
0x137c   :  { %v802_v40 = vmul.f32 %v800_v39, %v785_v30 }
0x137e   :  { %v809_v41 = vpack.c.bf16 %v802_v40, %v802_v40 }
0x1380   :  { %811 = vrot.lane.b32.xlu1 %v809_v41, %s1455_s4 }
0x13f2   :  { %v812_v42 = vpop.permute.xlu1 %811 }
0x13f3   :  { %1109 = vmatmul.mubr.msk.bf16.vlgmr.msra.gmra.mxu0 %vm218_vm1, %v812_v42 }
0x14b3   :  { %v850_v44 = vpop.f32.mrf.mxu0 }
0x14b4   :  { %v856_v45 = vadd.f32 %v850_v44, %v808_v43 }
0x14b5   :  { %v1110_v46 = vpop.f32.mrf.mxu0 }
0x14b6   :  { %v857_v47 = vmul.f32 %v856_v45, %v1666_v21 }
0x14b7   :  { %v853_v48 = vpop.f32.mrf.mxu0 }
0x14b8   :  { %1166 = vtanh.f32 %v857_v47 }
0x14b9   :  { %v1111_v49 = vpop.f32.mrf.mxu0 }
0x14c5   :  { %v1167_v50 = vpop.eup %1166 }
0x14c6   :  { %v859_v51 = vmul.f32 %v1167_v50, %v1666_v21 }
0x14c8   :  { %v860_v52 = vadd.f32 %v859_v51, %v1669_v26 }
0x14ca   :  { %863 = vrot.lane.b32.xlu0 %v860_v52, %s1440_s24  ;;  %v861_v21 = vmul.f32 %v860_v52, %v796_v35 }
0x153c   :  { %v864_v53 = vpop.permute.xlu0 %863 }
0x153d   :  { %v866_v54 = vmul.f32 %v864_v53, %v860_v52 }
0x153f   :  { %868 = vrot.lane.b32.xlu1 %v866_v54, %s1455_s4 }
0x1543   :  { %353 = vrot.lane.b32.xlu1 %v1676_v36, %s1455_s4 }
0x1547   :  { %504 = vrot.lane.b32.xlu1 %v1712_v15, %s1455_s4 }
0x154b   :  { %654 = vrot.lane.b32.xlu1 %v1747_v59, %s1455_s4 }
0x154f   :  { %804 = vrot.lane.b32.xlu1 %v802_v40, %s1455_s4 }
0x15b1   :  { %v869_v55 = vpop.permute.xlu1 %868 }
0x15b2   :  { %v871_v26 = vadd.f32 %v869_v55, %v861_v21 }
0x15b4   :  { %1168 = vtanh.f32 %v871_v26  ;;  %884 = vrot.lane.b32.xlu1 %v871_v26, %s1456_s0 }
0x15b5   :  { %v354_v57 = vpop.permute.xlu1 %353 }
0x15b6   :  { %357 = vst.msk [vmem:[#allocation12] sm:$0x1] %vm356_vm5, %v354_v57 }
0x15b9   :  { %v505_v58 = vpop.permute.xlu1 %504 }
0x15ba   :  { %507 = vst.msk [vmem:[#allocation12 + $0x2] sm:$0x1] %vm356_vm5, %v505_v58 }
0x15bd   :  { %v655_v36 = vpop.permute.xlu1 %654 }
0x15be   :  { %657 = vst.msk [vmem:[#allocation12 + $0x4] sm:$0x1] %vm356_vm5, %v655_v36 }
0x15c1   :  { %v1169_v15 = vpop.eup %1168  ;;  %v805_v59 = vpop.permute.xlu1 %804 }
0x15c2   :  { %807 = vst.msk [vmem:[#allocation12 + $0x6] sm:$0x1] %vm356_vm5, %v805_v59  ;;  %874 = vrot.lane.b32.xlu0 %v1169_v15, %s1440_s24  ;;  %s1457_s24 = smov [#allocation12]  }
0x15c3   :  { %s893_s29 = sshll.u32 %s1457_s24, 4  ;;  %s894_s29 = int_to_ptr.vmem [resolvable:$true] %s893_s29 }
0x15c4   :  { %s1394_s12 = scalar_lea.vmem %s894_s29, 256  ;;  %p1399_p7 = scmp.lt.s32.totalorder %s894_s29, %s894_s29 }
0x15c5   :  { %p1395_p6 = scmp.ne.s32.totalorder %s894_s29, %s1394_s12  ;;  %p1400_p8 = scmp.lt.s32.totalorder %s1394_s12, %s1394_s12 }
0x15c6   :  { %429 = vrot.lane.b32.xlu0 %v1694_v56, %s1455_s4 }
0x15c7   :  { %p1401_p9 = por %p1400_p8, %p1399_p7 }
0x15c9   :  { %p1402_p10 = pnand %p1401_p9, %p1395_p6 }
0x15ca   :  { %579 = vrot.lane.b32.xlu0 %v1730_v38, %s1455_s4 }
0x15ce   :  { %729 = vrot.lane.b32.xlu0 %v1764_v16, %s1455_s4 }
0x1626   :  { %v885_v60 = vpop.permute.xlu1 %884 }
0x1627   :  { %887 = vst.msk [vmem:[#allocation12 + $0x8] sm:$0x1] %vm356_vm5, %v885_v60 }
0x1634   :  { %v875_v61 = vpop.permute.xlu0 %874 }
0x1635   :  { %v877_v62 = vmul.f32 %v875_v61, %v860_v52 }
0x1637   :  { %879 = vrot.lane.b32.xlu0 %v877_v62, %s1455_s4 }
0x1638   :  { %v430_v63 = vpop.permute.xlu0 %429 }
0x1639   :  { %432 = vst.msk [vmem:[#allocation12 + $0x1] sm:$0x1] %vm356_vm5, %v430_v63 }
0x163c   :  { %v580_v1 = vpop.permute.xlu0 %579 }
0x163d   :  { %582 = vst.msk [vmem:[#allocation12 + $0x3] sm:$0x1] %vm356_vm5, %v580_v1 }
0x1640   :  { %v730_v56 = vpop.permute.xlu0 %729 }
0x1641   :  { %732 = vst.msk [vmem:[#allocation12 + $0x5] sm:$0x1] %vm356_vm5, %v730_v56 }
0x16a9   :  { %v880_v38 = vpop.permute.xlu0 %879 }
0x16aa   :  { %882 = vst.msk [vmem:[#allocation12 + $0x7] sm:$0x1] %vm356_vm5, %v880_v38 }
0x16ab   :  { %1405 = shalt.err (!%p1402_p10)
}
0x16ac   :  { %s1458_s27 = smov 128   ;;  %s1459_s28 = smov 8  }
0x16ad   :  { %899 = dma.vmem_to_hbm [thread:$0]  %s894_s29, 256, %s1815_s5, [#allocation9], %s1458_s27, %s1458_s27, %s1459_s28  }
0x16ae   :  { %1436 = dma.done.wait [#allocation9], 256  }
0x16af   :  { %1437 = vsyncadd [#allocation9], 4294967040 }
0x16b0   :  { %903 = vsyncpa [#allocation8], 1 }
0x16b1   :  { %904 = vsyncpa [#allocation11], 1 }
0x16b2   :  { %905 = vsyncpa [#allocation9], 1 }
0x16b3   :  { %906 = vsyncmov [#allocation4] }
0x16b6   :  { %s907_s6 = vpop.sfrf %906 }
0x16b7   :  { %p1005_p11 = scmp.ne.s32.totalorder %s907_s6, 0 }
0x16b9   :  { %911 = shalt.err (%p1005_p11)  }
0x16ba   :  { %913 = vsyncmov [#allocation4 + $0x1] }
0x16bd   :  { %s914_s2 = vpop.sfrf %913 }
0x16be   :  { %p1006_p12 = scmp.ne.s32.totalorder %s914_s2, 0 }
0x16c0   :  { %918 = shalt.err (%p1006_p12)  }
0x16c1   :  { %920 = vsyncmov [#allocation4 + $0x2] }
0x16c4   :  { %s921_s7 = vpop.sfrf %920 }
0x16c5   :  { %p1007_p13 = scmp.ne.s32.totalorder %s921_s7, 0 }
0x16c7   :  { %925 = shalt.err (%p1007_p13)  }
0x16c8   :  { %927 = vsyncmov [#allocation4 + $0x3] }
0x16cb   :  { %s928_s9 = vpop.sfrf %927 }
0x16cc   :  { %p1008_p0 = scmp.ne.s32.totalorder %s928_s9, 0 }
0x16ce   :  { %932 = shalt.err (%p1008_p0)  }
0x16cf   :  { %934 = vsyncmov [#allocation4 + $0x4] }
0x16d2   :  { %s935_s5 = vpop.sfrf %934 }
0x16d3   :  { %p1009_p1 = scmp.ne.s32.totalorder %s935_s5, 0 }
0x16d5   :  { %939 = shalt.err (%p1009_p1)  }
0x16d6   :  { %941 = vsyncmov [#allocation4 + $0x5] }
0x16d9   :  { %s942_s13 = vpop.sfrf %941 }
0x16da   :  { %p1010_p2 = scmp.ne.s32.totalorder %s942_s13, 0 }
0x16dc   :  { %946 = shalt.err (%p1010_p2)  }
0x16dd   :  { %948 = vsyncmov [#allocation4 + $0x6] }
0x16e0   :  { %s949_s15 = vpop.sfrf %948 }
0x16e1   :  { %p1011_p3 = scmp.ne.s32.totalorder %s949_s15, 0 }
0x16e3   :  { %953 = shalt.err (%p1011_p3)  }
0x16e4   :  { %955 = vsyncmov [#allocation4 + $0x7] }
0x16e7   :  { %s956_s18 = vpop.sfrf %955 }
0x16e8   :  { %p1012_p4 = scmp.ne.s32.totalorder %s956_s18, 0 }
0x16ea   :  { %960 = shalt.err (%p1012_p4)  }

</bundles_post_ra>
